<compile_context>
chip_gen: v6e
topology: v6e:2x2x1
jax: 0.10.0
libtpu: 0.0.40
codegen_flags: <defaults>
</compile_context>

<pallas_src>
import jax
import jax.numpy as jnp
from jax.experimental import pallas as pl
from jax.experimental.pallas import tpu as pltpu


# Fixed architecture widths after offline fusion:
#   F -> 256 (ELU) -> 64 (ELU) -> 64 (ELU) -> 64 (ELU) -> 1 -> sigmoid -> clamp
H1 = 256
H2 = 64

# Layout of the packed (1, PACK_W) f32 bias/row buffer (128-aligned slots).
OFF_B12 = 0      # (1, 256)
OFF_B34 = 256    # (1, 64)
OFF_B5 = 384     # (1, 64)
OFF_B6 = 512     # (1, 64)
OFF_W7 = 640     # (1, 64)  -- final layer weight as a row vector
OFF_B7 = 768     # (1, 1)
PACK_W = 896     # 7 * 128


# ----------------------------------------------------------------------------
# Kernel
# ----------------------------------------------------------------------------
def mlp_kernel(x_ref, w12_ref, wsmall_ref, pack_ref, o_ref):
    f32 = jnp.float32
    bf16 = jnp.bfloat16

    def elu(h):
        # ELU(alpha=1).  min() keeps the unselected branch finite (no inf).
        neg = jnp.minimum(h, 0.0)
        return jnp.where(h > 0.0, h, jnp.exp(neg) - 1.0)

    # Biases / final row vector (f32).
    b12 = pack_ref[:, OFF_B12:OFF_B12 + H1]
    b34 = pack_ref[:, OFF_B34:OFF_B34 + H2]
    b5 = pack_ref[:, OFF_B5:OFF_B5 + H2]
    b6 = pack_ref[:, OFF_B6:OFF_B6 + H2]
    w7r = pack_ref[:, OFF_W7:OFF_W7 + H2]
    b7 = pack_ref[:, OFF_B7:OFF_B7 + 1]

    # Small bf16 weights, concatenated along the row (sublane) axis.
    w34 = wsmall_ref[0:H1, :]                 # (256, 64)
    w5 = wsmall_ref[H1:H1 + H2, :]            # (64, 64)
    w6 = wsmall_ref[H1 + H2:H1 + 2 * H2, :]   # (64, 64)

    x = x_ref[...].astype(bf16)

    # Fused Linear(F,1024)+Linear(1024,256), then ELU.
    h = jnp.dot(x, w12_ref[...], preferred_element_type=f32) + b12
    h = elu(h)
    # Fused Linear(256,128)+Linear(128,64), then ELU.
    h = jnp.dot(h.astype(bf16), w34, preferred_element_type=f32) + b34
    h = elu(h)
    # Linear(64,64) + ELU.
    h = jnp.dot(h.astype(bf16), w5, preferred_element_type=f32) + b5
    h = elu(h)
    # Linear(64,64) + ELU.
    h = jnp.dot(h.astype(bf16), w6, preferred_element_type=f32) + b6
    h = elu(h)

    # Final Linear(64, 1), emitted lane-dense: out[0, b] = y[row b].
    # This is the standard "A @ B^T" MXU contraction (M=1, K=64, N=bt) and
    # avoids a (bt, 1) column store (~bt/8 masked vst.msk per step).
    y = jnp.einsum('ok,bk->ob', w7r.astype(bf16), h.astype(bf16),
                   preferred_element_type=f32) + b7          # (1, bt)

    # Numerically stable sigmoid; torch.clamp(., 0, 1) afterwards is a no-op
    # mathematically but kept for exact spec fidelity (costs ~2 VPU ops).
    z = jnp.exp(-jnp.abs(y))
    sig = jnp.where(y >= 0.0, 1.0 / (1.0 + z), z / (1.0 + z))
    o_ref[...] = jnp.clip(sig, 0.0, 1.0)[None].astype(o_ref.dtype)


# ----------------------------------------------------------------------------
# Wrapper
# ----------------------------------------------------------------------------
def _round_up(n, m):
    return ((n + m - 1) // m) * m


def _vmem_cap_bytes():
    """Generation-aware VMEM ceiling (leave ~25% headroom; safe fallback)."""
    try:
        cap = int(pltpu.get_tpu_info().vmem_capacity_bytes)
        return max(32 << 20, min((cap * 3) // 4, 100 << 20))
    except Exception:
        return 48 << 20   # safe even on v7x (64 MiB physical VMEM)


def mlp_forward(x, fused_params, *, b_tile=4096):
    """x: (B, num_features) f32.  fused_params: (w12_bf16, w_small_bf16, pack_f32)."""
    w12, w_small, pack = fused_params
    B, F = x.shape
    assert b_tile % 128 == 0 and b_tile > 0

    # Batch tile: multiple of 128 (lane-dense output block), capped at b_tile,
    # and sized so B splits into >=2 grid steps whenever possible — this lets
    # dimension_semantics=("parallel",) use both v7x TensorCores.
    half = -(-B // 2)                               # ceil(B / 2)
    bt = min(b_tile, _round_up(max(half, 1), 128))
    Bp = _round_up(B, bt)
    if Bp != B:
        x = jnp.pad(x, ((0, Bp - B), (0, 0)))
    grid_n = Bp // bt

    # Tile-aware VMEM budget: double-buffered x/out tiles + resident weights
    # (double-buffered by default) + generous headroom for f32/bf16
    # intermediates, clamped to the generation cap.
    weight_bytes = w12.size * 2 + w_small.size * 2 + pack.size * 4
    vmem_bytes = (2 * bt * F * 4          # x double buffer
                  + 2 * bt * 4            # out double buffer
                  + 2 * weight_bytes      # resident weights
                  + 6 * bt * H1 * 4       # intermediate / compiler scratch headroom
                  + (2 << 20))
    vmem_bytes = int(max(32 << 20, min(vmem_bytes, _vmem_cap_bytes())))

    out = pl.pallas_call(
        mlp_kernel,
        out_shape=jax.ShapeDtypeStruct((grid_n, 1, bt), jnp.float32),
        grid=(grid_n,),
        in_specs=[
            pl.BlockSpec((bt, F), lambda i: (i, 0)),        # x: tiled on batch
            pl.BlockSpec(w12.shape, lambda i: (0, 0)),      # weights stay resident
            pl.BlockSpec(w_small.shape, lambda i: (0, 0)),
            pl.BlockSpec(pack.shape, lambda i: (0, 0)),
        ],
        # Lane-dense output: one (1, bt) row per grid step (block == full
        # trailing dims, so no (8,128) constraint issues).
        out_specs=pl.BlockSpec((1, 1, bt), lambda i: (i, 0, 0)),
        compiler_params=pltpu.CompilerParams(
            dimension_semantics=("parallel",),
            vmem_limit_bytes=vmem_bytes,
        ),
    )(x, w12, w_small, pack)

    return out.reshape(Bp, 1)[:B]


def fuse_params(params):
    """Collapse Linear pairs, cast weights to bf16, pack small operands."""
    (w1, b1, w2, b2, w3, b3, w4, b4, w5, b5, w6, b6, w7, b7) = params

    # Exact algebraic fusion (done once, in f32, outside the kernel).
    # NOTE: casting the 1024-term fused W12 to bf16 is the dominant error
    # source vs the per-layer f32 PyTorch model (well within 2e-2 here).
    w12 = w1 @ w2                 # (F, 256)
    b12 = b1 @ w2 + b2            # (1, 256)
    w34 = w3 @ w4                 # (256, 64)
    b34 = b3 @ w4 + b4            # (1, 64)

    w12_bf16 = w12.astype(jnp.bfloat16)
    w_small = jnp.concatenate(
        [w34.astype(jnp.bfloat16),
         w5.astype(jnp.bfloat16),
         w6.astype(jnp.bfloat16)],
        axis=0,
    )                             # (384, 64) bf16

    pack = jnp.zeros((1, PACK_W), jnp.float32)
    pack = pack.at[:, OFF_B12:OFF_B12 + H1].set(b12)
    pack = pack.at[:, OFF_B34:OFF_B34 + H2].set(b34)
    pack = pack.at[:, OFF_B5:OFF_B5 + H2].set(b5)
    pack = pack.at[:, OFF_B6:OFF_B6 + H2].set(b6)
    pack = pack.at[:, OFF_W7:OFF_W7 + H2].set(w7.reshape(1, H2))
    pack = pack.at[:, OFF_B7:OFF_B7 + 1].set(b7)

    return w12_bf16, w_small, pack


def init_params(key, num_features):
    """PyTorch-style init: uniform(+-1/sqrt(fan_in)); weights stored (in, out)."""
    dims = [num_features, 1024, 256, 128, 64, 64, 64, 1]
    params = []
    for i in range(len(dims) - 1):
        fan_in, fan_out = dims[i], dims[i + 1]
        key, kw, kb = jax.random.split(key, 3)
        bound = 1.0 / jnp.sqrt(jnp.float32(fan_in))
        w = jax.random.uniform(kw, (fan_in, fan_out), jnp.float32,
                               minval=-bound, maxval=bound)
        b = jax.random.uniform(kb, (1, fan_out), jnp.float32,
                               minval=-bound, maxval=bound)
        params += [w, b]
    return params


# ----------------------------------------------------------------------------
# Pure-JAX references
# ----------------------------------------------------------------------------
def mlp_reference_f32(x, params):
    """Per-layer f32 reference (semantics of the original PyTorch module)."""
    elu_after = {1, 3, 4, 5}
    h = x
    for i in range(7):
        w, b = params[2 * i], params[2 * i + 1]
        h = h @ w + b
        if i in elu_after:
            h = jnp.where(h > 0.0, h, jnp.exp(jnp.minimum(h, 0.0)) - 1.0)
    h = 1.0 / (1.0 + jnp.exp(-h))
    return jnp.clip(h, 0.0, 1.0)


def mlp_reference_fused(x, fused_params):
    """Reference mirroring the kernel's fusion + bf16 matmul numerics."""
    w12, w_small, pack = fused_params
    b12 = pack[:, OFF_B12:OFF_B12 + H1]
    b34 = pack[:, OFF_B34:OFF_B34 + H2]
    b5 = pack[:, OFF_B5:OFF_B5 + H2]
    b6 = pack[:, OFF_B6:OFF_B6 + H2]
    w7r = pack[:, OFF_W7:OFF_W7 + H2]
    b7 = pack[:, OFF_B7:OFF_B7 + 1]
    w34 = w_small[0:H1]
    w5 = w_small[H1:H1 + H2]
    w6 = w_small[H1 + H2:H1 + 2 * H2]

    def elu(h):
        return jnp.where(h > 0.0, h, jnp.exp(jnp.minimum(h, 0.0)) - 1.0)

    def lin(h, w, b):
        return jnp.dot(h.astype(jnp.bfloat16), w,
                       preferred_element_type=jnp.float32) + b

    h = elu(lin(x, w12, b12))
    h = elu(lin(h, w34, b34))
    h = elu(lin(h, w5, b5))
    h = elu(lin(h, w6, b6))
    y = jnp.dot(h.astype(jnp.bfloat16), w7r.astype(jnp.bfloat16).T,
                preferred_element_type=jnp.float32) + b7
    s = 1.0 / (1.0 + jnp.exp(-y))
    return jnp.clip(s, 0.0, 1.0)


if __name__ == "__main__":
    num_features = 32
    batch = 8

    key = jax.random.PRNGKey(0)
    key, kx = jax.random.split(key)
    x = jax.random.normal(kx, (batch, num_features), dtype=jnp.float32)

    params = init_params(key, num_features)
    fused = fuse_params(params)

    out = jax.block_until_ready(mlp_forward(x, fused))
    assert out.shape == (batch, 1)

    # Tight check vs a pure-JAX reference matching the kernel's fusion and
    # bf16 matmul numerics.
    ref_fused = mlp_reference_fused(x, fused)
    assert jnp.allclose(out, ref_fused, atol=2e-3, rtol=2e-3), "mismatch vs fused ref"

    # Loose check vs the per-layer f32 reference (differences come only from
    # bf16 weight/activation rounding of the mathematically exact fusion).
    ref_f32 = mlp_reference_f32(x, params)
    assert jnp.allclose(out, ref_f32, atol=2e-2), "mismatch vs f32 reference"

    print("KERNEL_OK")
</pallas_src>

<mosaic_0001>
module attributes {stable_mosaic.version = 11 : i64} {
  func.func @mlp_kernel(%arg0: i32, %arg1: memref<128x32xf32, #tpu.memory_space<vmem>>, %arg2: memref<32x256xbf16, #tpu.memory_space<vmem>>, %arg3: memref<384x64xbf16, #tpu.memory_space<vmem>>, %arg4: memref<1x896xf32, #tpu.memory_space<vmem>>, %arg5: memref<1x1x128xf32, #tpu.memory_space<vmem>>) attributes {dimension_semantics = [#tpu.dimension_semantics<parallel>], iteration_bounds = array<i64: 1>, scalar_prefetch = 0 : i64, scratch_operands = 0 : i64, tpu.core_type = #tpu.core_type<tc>, window_params = [{transform_indices = @transform_0, window_bounds = array<i64: 128, 32>}, {pipeline_mode = #tpu.pipeline_mode<synchronous>, transform_indices = @transform_1, window_bounds = array<i64: 32, 256>}, {pipeline_mode = #tpu.pipeline_mode<synchronous>, transform_indices = @transform_2, window_bounds = array<i64: 384, 64>}, {pipeline_mode = #tpu.pipeline_mode<synchronous>, transform_indices = @transform_3, window_bounds = array<i64: 1, 896>}, {transform_indices = @transform_4, window_bounds = array<i64: 1, 1, 128>}]} {
    %c0 = arith.constant 0 : index
    %c0_0 = arith.constant 0 : index
    %0 = vector.load %arg4[%c0, %c0_0] : memref<1x896xf32, #tpu.memory_space<vmem>>, vector<1x256xf32>
    %c0_1 = arith.constant 0 : index
    %c256 = arith.constant 256 : index
    %1 = vector.load %arg4[%c0_1, %c256] : memref<1x896xf32, #tpu.memory_space<vmem>>, vector<1x64xf32>
    %c0_2 = arith.constant 0 : index
    %c384 = arith.constant 384 : index
    %2 = vector.load %arg4[%c0_2, %c384] : memref<1x896xf32, #tpu.memory_space<vmem>>, vector<1x64xf32>
    %c0_3 = arith.constant 0 : index
    %c512 = arith.constant 512 : index
    %3 = vector.load %arg4[%c0_3, %c512] : memref<1x896xf32, #tpu.memory_space<vmem>>, vector<1x64xf32>
    %c0_4 = arith.constant 0 : index
    %c640 = arith.constant 640 : index
    %4 = vector.load %arg4[%c0_4, %c640] : memref<1x896xf32, #tpu.memory_space<vmem>>, vector<1x64xf32>
    %c0_5 = arith.constant 0 : index
    %c768 = arith.constant 768 : index
    %5 = vector.load %arg4[%c0_5, %c768] : memref<1x896xf32, #tpu.memory_space<vmem>>, vector<1x1xf32>
    %c0_6 = arith.constant 0 : index
    %c0_7 = arith.constant 0 : index
    %6 = vector.load %arg3[%c0_6, %c0_7] : memref<384x64xbf16, #tpu.memory_space<vmem>>, vector<256x64xbf16>
    %c256_8 = arith.constant 256 : index
    %c0_9 = arith.constant 0 : index
    %7 = vector.load %arg3[%c256_8, %c0_9] : memref<384x64xbf16, #tpu.memory_space<vmem>>, vector<64x64xbf16>
    %c320 = arith.constant 320 : index
    %c0_10 = arith.constant 0 : index
    %8 = vector.load %arg3[%c320, %c0_10] : memref<384x64xbf16, #tpu.memory_space<vmem>>, vector<64x64xbf16>
    %c0_11 = arith.constant 0 : index
    %c0_12 = arith.constant 0 : index
    %9 = vector.load %arg1[%c0_11, %c0_12] : memref<128x32xf32, #tpu.memory_space<vmem>>, vector<128x32xf32>
    %10 = arith.truncf %9 : vector<128x32xf32> to vector<128x32xbf16>
    %c0_13 = arith.constant 0 : index
    %c0_14 = arith.constant 0 : index
    %11 = vector.load %arg2[%c0_13, %c0_14] : memref<32x256xbf16, #tpu.memory_space<vmem>>, vector<32x256xbf16>
    %cst = arith.constant dense<0.000000e+00> : vector<128x256xf32>
    %12 = tpu.matmul %10, %11, %cst {dimension_numbers = #tpu.dot_dimension_numbers<[1], [0], [0], [1], [0, 0, 1, 1], [], []>} : vector<128x32xbf16>, vector<32x256xbf16>, vector<128x256xf32> -> vector<128x256xf32>
    %13 = vector.broadcast %0 : vector<1x256xf32> to vector<128x256xf32>
    %14 = arith.addf %12, %13 : vector<128x256xf32>
    %cst_15 = arith.constant 0.000000e+00 : f32
    %15 = vector.broadcast %cst_15 : f32 to vector<128x256xf32>
    %16 = arith.minimumf %14, %15 : vector<128x256xf32>
    %cst_16 = arith.constant 0.000000e+00 : f32
    %17 = vector.broadcast %cst_16 : f32 to vector<128x256xf32>
    %18 = arith.cmpf ogt, %14, %17 : vector<128x256xf32>
    %19 = math.exp %16 : vector<128x256xf32>
    %cst_17 = arith.constant 1.000000e+00 : f32
    %20 = vector.broadcast %cst_17 : f32 to vector<128x256xf32>
    %21 = arith.subf %19, %20 : vector<128x256xf32>
    %22 = arith.select %18, %14, %21 : vector<128x256xi1>, vector<128x256xf32>
    %23 = arith.truncf %22 : vector<128x256xf32> to vector<128x256xbf16>
    %cst_18 = arith.constant dense<0.000000e+00> : vector<128x64xf32>
    %24 = tpu.matmul %23, %6, %cst_18 {dimension_numbers = #tpu.dot_dimension_numbers<[1], [0], [0], [1], [0, 0, 1, 1], [], []>} : vector<128x256xbf16>, vector<256x64xbf16>, vector<128x64xf32> -> vector<128x64xf32>
    %25 = vector.broadcast %1 : vector<1x64xf32> to vector<128x64xf32>
    %26 = arith.addf %24, %25 : vector<128x64xf32>
    %cst_19 = arith.constant 0.000000e+00 : f32
    %27 = vector.broadcast %cst_19 : f32 to vector<128x64xf32>
    %28 = arith.minimumf %26, %27 : vector<128x64xf32>
    %cst_20 = arith.constant 0.000000e+00 : f32
    %29 = vector.broadcast %cst_20 : f32 to vector<128x64xf32>
    %30 = arith.cmpf ogt, %26, %29 : vector<128x64xf32>
    %31 = math.exp %28 : vector<128x64xf32>
    %cst_21 = arith.constant 1.000000e+00 : f32
    %32 = vector.broadcast %cst_21 : f32 to vector<128x64xf32>
    %33 = arith.subf %31, %32 : vector<128x64xf32>
    %34 = arith.select %30, %26, %33 : vector<128x64xi1>, vector<128x64xf32>
    %35 = arith.truncf %34 : vector<128x64xf32> to vector<128x64xbf16>
    %cst_22 = arith.constant dense<0.000000e+00> : vector<128x64xf32>
    %36 = tpu.matmul %35, %7, %cst_22 {dimension_numbers = #tpu.dot_dimension_numbers<[1], [0], [0], [1], [0, 0, 1, 1], [], []>} : vector<128x64xbf16>, vector<64x64xbf16>, vector<128x64xf32> -> vector<128x64xf32>
    %37 = vector.broadcast %2 : vector<1x64xf32> to vector<128x64xf32>
    %38 = arith.addf %36, %37 : vector<128x64xf32>
    %cst_23 = arith.constant 0.000000e+00 : f32
    %39 = vector.broadcast %cst_23 : f32 to vector<128x64xf32>
    %40 = arith.minimumf %38, %39 : vector<128x64xf32>
    %cst_24 = arith.constant 0.000000e+00 : f32
    %41 = vector.broadcast %cst_24 : f32 to vector<128x64xf32>
    %42 = arith.cmpf ogt, %38, %41 : vector<128x64xf32>
    %43 = math.exp %40 : vector<128x64xf32>
    %cst_25 = arith.constant 1.000000e+00 : f32
    %44 = vector.broadcast %cst_25 : f32 to vector<128x64xf32>
    %45 = arith.subf %43, %44 : vector<128x64xf32>
    %46 = arith.select %42, %38, %45 : vector<128x64xi1>, vector<128x64xf32>
    %47 = arith.truncf %46 : vector<128x64xf32> to vector<128x64xbf16>
    %cst_26 = arith.constant dense<0.000000e+00> : vector<128x64xf32>
    %48 = tpu.matmul %47, %8, %cst_26 {dimension_numbers = #tpu.dot_dimension_numbers<[1], [0], [0], [1], [0, 0, 1, 1], [], []>} : vector<128x64xbf16>, vector<64x64xbf16>, vector<128x64xf32> -> vector<128x64xf32>
    %49 = vector.broadcast %3 : vector<1x64xf32> to vector<128x64xf32>
    %50 = arith.addf %48, %49 : vector<128x64xf32>
    %cst_27 = arith.constant 0.000000e+00 : f32
    %51 = vector.broadcast %cst_27 : f32 to vector<128x64xf32>
    %52 = arith.minimumf %50, %51 : vector<128x64xf32>
    %cst_28 = arith.constant 0.000000e+00 : f32
    %53 = vector.broadcast %cst_28 : f32 to vector<128x64xf32>
    %54 = arith.cmpf ogt, %50, %53 : vector<128x64xf32>
    %55 = math.exp %52 : vector<128x64xf32>
    %cst_29 = arith.constant 1.000000e+00 : f32
    %56 = vector.broadcast %cst_29 : f32 to vector<128x64xf32>
    %57 = arith.subf %55, %56 : vector<128x64xf32>
    %58 = arith.select %54, %50, %57 : vector<128x64xi1>, vector<128x64xf32>
    %59 = arith.truncf %4 : vector<1x64xf32> to vector<1x64xbf16>
    %60 = arith.truncf %58 : vector<128x64xf32> to vector<128x64xbf16>
    "tpu.trace_start"() <{level = 10 : i32, message = "ok,bk->ob"}> : () -> ()
    %cst_30 = arith.constant dense<0.000000e+00> : vector<1x128xf32>
    %61 = tpu.matmul %59, %60, %cst_30 {dimension_numbers = #tpu.dot_dimension_numbers<[1], [1], [0], [0], [0, 0, 1, 0], [], []>} : vector<1x64xbf16>, vector<128x64xbf16>, vector<1x128xf32> -> vector<1x128xf32>
    "tpu.trace_stop"() : () -> ()
    %62 = vector.broadcast %5 : vector<1x1xf32> to vector<1x128xf32>
    %63 = arith.addf %61, %62 : vector<1x128xf32>
    %64 = math.absf %63 : vector<1x128xf32>
    %cst_31 = arith.constant 0.000000e+00 : f32
    %65 = vector.broadcast %cst_31 : f32 to vector<1x128xf32>
    %66 = arith.subf %65, %64 : vector<1x128xf32>
    %67 = math.exp %66 : vector<1x128xf32>
    %cst_32 = arith.constant 0.000000e+00 : f32
    %68 = vector.broadcast %cst_32 : f32 to vector<1x128xf32>
    %69 = arith.cmpf oge, %63, %68 : vector<1x128xf32>
    %cst_33 = arith.constant 1.000000e+00 : f32
    %70 = vector.broadcast %cst_33 : f32 to vector<1x128xf32>
    %71 = arith.addf %70, %67 : vector<1x128xf32>
    %cst_34 = arith.constant 1.000000e+00 : f32
    %72 = vector.broadcast %cst_34 : f32 to vector<1x128xf32>
    %73 = arith.divf %72, %71 : vector<1x128xf32>
    %cst_35 = arith.constant 1.000000e+00 : f32
    %74 = vector.broadcast %cst_35 : f32 to vector<1x128xf32>
    %75 = arith.addf %74, %67 : vector<1x128xf32>
    %76 = arith.divf %67, %75 : vector<1x128xf32>
    %77 = arith.select %69, %73, %76 : vector<1x128xi1>, vector<1x128xf32>
    %cst_36 = arith.constant 0.000000e+00 : f32
    %cst_37 = arith.constant 1.000000e+00 : f32
    %78 = vector.broadcast %cst_36 : f32 to vector<1x128xf32>
    %79 = arith.maximumf %78, %77 : vector<1x128xf32>
    %80 = vector.broadcast %cst_37 : f32 to vector<1x128xf32>
    %81 = arith.minimumf %80, %79 : vector<1x128xf32>
    %82 = vector.shape_cast %81 : vector<1x128xf32> to vector<1x1x128xf32>
    %c0_38 = arith.constant 0 : index
    %c0_39 = arith.constant 0 : index
    %c0_40 = arith.constant 0 : index
    %83 = vector.load %arg5[%c0_38, %c0_39, %c0_40] : memref<1x1x128xf32, #tpu.memory_space<vmem>>, vector<1x1x128xf32>
    tpu.vector_store %arg5[%c0_38, %c0_39, %c0_40], %82 {strides = array<i32>} : memref<1x1x128xf32, #tpu.memory_space<vmem>>, vector<1x1x128xf32>,
    return
  }
  func.func @transform_0(%arg0: i32) -> (i32, i32) {
    %c0_i32 = arith.constant 0 : i32
    %c0_i32_0 = arith.constant 0 : i32
    return %arg0, %c0_i32 : i32, i32
  }
  func.func @transform_1(%arg0: i32) -> (i32, i32) {
    %c0_i32 = arith.constant 0 : i32
    %c0_i32_0 = arith.constant 0 : i32
    %c0_i32_1 = arith.constant 0 : i32
    return %c0_i32, %c0_i32_0 : i32, i32
  }
  func.func @transform_2(%arg0: i32) -> (i32, i32) {
    %c0_i32 = arith.constant 0 : i32
    %c0_i32_0 = arith.constant 0 : i32
    %c0_i32_1 = arith.constant 0 : i32
    return %c0_i32, %c0_i32_0 : i32, i32
  }
  func.func @transform_3(%arg0: i32) -> (i32, i32) {
    %c0_i32 = arith.constant 0 : i32
    %c0_i32_0 = arith.constant 0 : i32
    %c0_i32_1 = arith.constant 0 : i32
    return %c0_i32, %c0_i32_0 : i32, i32
  }
  func.func @transform_4(%arg0: i32) -> (i32, i32, i32) {
    %c0_i32 = arith.constant 0 : i32
    %c0_i32_0 = arith.constant 0 : i32
    %c0_i32_1 = arith.constant 0 : i32
    return %arg0, %c0_i32, %c0_i32_0 : i32, i32, i32
  }
}

</mosaic_0001>

<bundles_post_ra>
// kernel: tpu_custom_call.1
= control target key start
LH: loop header
LB: loop body
LE: loop exit
PB: predicated region body
PF: predicated region fallthrough
CT: control target
= control target key end

     0   :  { %v1918_v2 = vmov 0   ;;  %vm132_vm0 = vcmask 261120   ;;  %s2516_s0 = inlined_call_operand.vmem [shape: f32[128,32], index: 0, kind: input, shape index: {}]   ;;  %s2517_s1 = inlined_call_operand.vmem [shape: bf16[32,256], index: 1, kind: input, shape index: {}]   ;;  %s2518_s2 = inlined_call_operand.vmem [shape: bf16[384,64], index: 2, kind: input, shape index: {}]   ;;  %s2519_s3 = inlined_call_operand.vmem [shape: f32[1,896], index: 3, kind: input, shape index: {}]   ;;  %s2520_s4 = inlined_call_operand.hbm [shape: f32[1,1,128], index: 4, kind: output, shape index: {}]  }
   0x1   :  { %v1702_v0 = vld [vmem:[%s2517_s1 + $0x14] ss:$8 sps:$4 sm:$0xff]   ;;  %v1704_v1 = vld [vmem:[%s2517_s1 + $0x10] ss:$8 sps:$4 sm:$0xff]   ;;  %189 = vmatprep.mubr.bf16.mxu0 %v1918_v2  ;;  %1701 = vset.pattern.permute.xlu0 %v1918_v2  ;;  %v1705_v3 = vld [vmem:[%s2517_s1 + $0x4] ss:$8 sps:$4 sm:$0xff]  }
   0x2   :  { %169 = vmatprep.subr.bf16.mxu0 %v1702_v0  ;;  %v1707_v4 = vld [vmem:[%s2517_s1] ss:$8 sps:$4 sm:$0xff]   ;;  %v75_v8 = vld [vmem:[%s2516_s0 + $0x10] sm:$0xff]  ;;  %v76_v9 = vld [vmem:[%s2516_s0 + $0x18] sm:$0xff] }
   0x3   :  { %170 = vmatpush1.bf16.msra.mxu0 %v1704_v1  ;;  %v73_v5 = vld [vmem:[%s2516_s0] sm:$0xff]  ;;  %v74_v6 = vld [vmem:[%s2516_s0 + $0x8] sm:$0xff]  ;;  %v90_v10 = vpack.c.bf16 %v76_v9, %v75_v8 }
   0x4   :  { %171 = vmatprep.subr.bf16.mxu0 %v1705_v3  ;;  %v89_v7 = vpack.c.bf16 %v74_v6, %v73_v5  ;;  %v77_v11 = vld [vmem:[%s2516_s0 + $0x20] sm:$0xff]  ;;  %v78_v12 = vld [vmem:[%s2516_s0 + $0x28] sm:$0xff] }
   0x5   :  { %v91_v13 = vpack.c.bf16 %v78_v12, %v77_v11 }
   0x7   :  { %172 = vmatpush1.bf16.msra.mxu0 %v1707_v4 }
   0xa   :  { %1400 = vmatmul.mubr.msk.bf16.vlgmr.msra.gmra.mxu0 %vm132_vm0, %v89_v7 }
   0xb   :  { %199 = vmatprep.mubr.bf16.mxu0 %v1918_v2 }
  0x12   :  { %1401 = vmatmul.mubr.msk.bf16.gmra.mxu0 %vm132_vm0, %v90_v10 }
  0x13   :  { %209 = vmatprep.mubr.bf16.mxu0 %v1918_v2 }
  0x14   :  { %9 = vsyncpa [#allocation3], 0  ;;  %v79_v14 = vld [vmem:[%s2516_s0 + $0x30] sm:$0xff]  ;;  %v80_v15 = vld [vmem:[%s2516_s0 + $0x38] sm:$0xff]  ;;  %v102_v45 = vlaneseq }
  0x15   :  { %v92_v16 = vpack.c.bf16 %v80_v15, %v79_v14  ;;  %v81_v17 = vld [vmem:[%s2516_s0 + $0x40] sm:$0xff]  ;;  %v82_v18 = vld [vmem:[%s2516_s0 + $0x48] sm:$0xff]  ;;  %v83_v20 = vld [vmem:[%s2516_s0 + $0x50] sm:$0xff] }
  0x16   :  { %v93_v19 = vpack.c.bf16 %v82_v18, %v81_v17  ;;  %v84_v21 = vld [vmem:[%s2516_s0 + $0x58] sm:$0xff]  ;;  %v85_v23 = vld [vmem:[%s2516_s0 + $0x60] sm:$0xff]  ;;  %v86_v24 = vld [vmem:[%s2516_s0 + $0x68] sm:$0xff]  ;;  %v2063_v46 = vshrl.u32 %v102_v45, 7 }
  0x17   :  { %v94_v22 = vpack.c.bf16 %v84_v21, %v83_v20  ;;  %v95_v25 = vpack.c.bf16 %v86_v24, %v85_v23  ;;  %v87_v26 = vld [vmem:[%s2516_s0 + $0x70] sm:$0xff]  ;;  %v88_v27 = vld [vmem:[%s2516_s0 + $0x78] sm:$0xff]  ;;  %v1712_v33 = vld [vmem:[%s2518_s2 + $0x68] sm:$0xff]  }
  0x18   :  { %v96_v28 = vpack.c.bf16 %v88_v27, %v87_v26  ;;  %v1708_v29 = vld [vmem:[%s2518_s2 + $0x78] sm:$0xff]   ;;  %v1710_v31 = vld [vmem:[%s2518_s2 + $0x70] sm:$0xff]   ;;  %v1713_v34 = vld [vmem:[%s2518_s2 + $0x28] sm:$0xff]   ;;  %v104_v47 = vsub.s32 0, %v2063_v46  ;;  %v108_v49 = vsub.s32 1, %v2063_v46 }
  0x19   :  { %v1709_v30 = vld [vmem:[%s2518_s2 + $0x38] sm:$0xff]   ;;  %1532 = vmatprep.subr.bf16.mxu1 %v1708_v29  ;;  %v1711_v32 = vld [vmem:[%s2518_s2 + $0x30] sm:$0xff]   ;;  %v1714_v35 = vld [vmem:[%s2518_s2 + $0x60] sm:$0xff]  }
  0x1a   :  { %1402 = vmatmul.mubr.msk.bf16.gmra.mxu0 %vm132_vm0, %v91_v13  ;;  %1533 = vmatpush3.bf16.msra.mxu1 %v1709_v30  ;;  %v1715_v36 = vld [vmem:[%s2518_s2 + $0x20] sm:$0xff]   ;;  %v1716_v37 = vld [vmem:[%s2518_s2 + $0x58] sm:$0xff]   ;;  %v1718_v39 = vld [vmem:[%s2518_s2 + $0x50] sm:$0xff]  }
  0x1b   :  { %219 = vmatprep.mubr.bf16.mxu0 %v1918_v2  ;;  %1534 = vmatprep.subr.bf16.mxu1 %v1710_v31  ;;  %v1717_v38 = vld [vmem:[%s2518_s2 + $0x18] sm:$0xff]   ;;  %v1719_v40 = vld [vmem:[%s2518_s2 + $0x10] sm:$0xff]   ;;  %v1720_v41 = vld [vmem:[%s2518_s2 + $0x48] sm:$0xff]  }
  0x1c   :  { %v1721_v42 = vld [vmem:[%s2518_s2 + $0x8] sm:$0xff]   ;;  %v1722_v43 = vld [vmem:[%s2518_s2 + $0x40] sm:$0xff]  }
  0x1d   :  { %v1723_v44 = vld [vmem:[%s2518_s2] sm:$0xff]  }
  0x1e   :  { %1535 = vmatpush3.bf16.msra.mxu1 %v1711_v32  ;;  %v19_v48 = vld [vmem:[%s2519_s3] sm:$0x3] }
  0x1f   :  { %1536 = vmatprep.subr.bf16.mxu1 %v1712_v33  ;;  %v2072_v50 = vrot.slane %v19_v48, %v104_v47  ;;  %v2074_v51 = vrot.slane %v19_v48, %v108_v49 }
  0x22   :  { %1403 = vmatmul.mubr.msk.bf16.gmra.mxu0 %vm132_vm0, %v92_v16  ;;  %1537 = vmatpush3.bf16.msra.mxu1 %v1713_v34 }
  0x23   :  { %229 = vmatprep.mubr.bf16.mxu0 %v1918_v2  ;;  %1538 = vmatprep.subr.bf16.mxu1 %v1714_v35 }
  0x26   :  { %1539 = vmatpush3.bf16.msra.mxu1 %v1715_v36 }
  0x27   :  { %1540 = vmatprep.subr.bf16.mxu1 %v1716_v37 }
  0x2a   :  { %1404 = vmatmul.mubr.msk.bf16.gmra.mxu0 %vm132_vm0, %v93_v19  ;;  %1541 = vmatpush3.bf16.msra.mxu1 %v1717_v38 }
  0x2b   :  { %239 = vmatprep.mubr.bf16.mxu0 %v1918_v2  ;;  %1542 = vmatprep.subr.bf16.mxu1 %v1718_v39 }
  0x2e   :  { %1543 = vmatpush3.bf16.msra.mxu1 %v1719_v40 }
  0x2f   :  { %1544 = vmatprep.subr.bf16.mxu1 %v1720_v41 }
  0x32   :  { %1405 = vmatmul.mubr.msk.bf16.gmra.mxu0 %vm132_vm0, %v94_v22  ;;  %1545 = vmatpush3.bf16.msra.mxu1 %v1721_v42 }
  0x33   :  { %249 = vmatprep.mubr.bf16.mxu0 %v1918_v2  ;;  %1546 = vmatprep.subr.bf16.mxu1 %v1722_v43 }
  0x36   :  { %1547 = vmatpush3.bf16.msra.mxu1 %v1723_v44 }
  0x3a   :  { %1406 = vmatmul.mubr.msk.bf16.gmra.mxu0 %vm132_vm0, %v95_v25 }
  0x3b   :  { %259 = vmatprep.mubr.bf16.mxu0 %v1918_v2 }
  0x42   :  { %1407 = vmatmul.mubr.msk.bf16.gmra.mxu0 %vm132_vm0, %v96_v28 }
  0xca   :  { %v191_v52 = vpop.f32.mrf.mxu0 }
  0xcb   :  { %v2077_v53 = vadd.f32 %v191_v52, %v2072_v50 }
  0xcc   :  { %v193_v54 = vpop.f32.mrf.mxu0 }
  0xcd   :  { %v2080_v55 = vadd.f32 %v193_v54, %v2074_v51  ;;  %v270_v56 = vmin.f32 %v2077_v53, 0.0  ;;  %vm302_vm4 = vcmp.gt.f32.partialorder %v2077_v53, 0.0 }
  0xce   :  { %v195_v57 = vpop.f32.mrf.mxu0 }
  0xcf   :  { %v271_v58 = vmin.f32 %v2080_v55, 0.0  ;;  %v2085_v59 = vadd.f32 %v195_v57, %v2072_v50  ;;  %v334_v63 = vmul.f32 1.442695, %v270_v56  ;;  %vm303_vm3 = vcmp.gt.f32.partialorder %v2080_v55, 0.0 }
  0xd0   :  { %v197_v60 = vpop.f32.mrf.mxu0 }
  0xd1   :  { %v336_v61 = vmul.f32 1.442695, %v271_v58  ;;  %v272_v62 = vmin.f32 %v2085_v59, 0.0  ;;  %v2089_v0 = vadd.f32 %v197_v60, %v2074_v51  ;;  %vm304_vm1 = vcmp.gt.f32.partialorder %v2085_v59, 0.0 }
  0xd2   :  { %v201_v1 = vpop.f32.mrf.mxu0 }
  0xd3   :  { %v338_v2 = vmul.f32 1.442695, %v272_v62  ;;  %v2092_v3 = vadd.f32 %v201_v1, %v2072_v50  ;;  %1732 = vpow2.f32 %v336_v61  ;;  %v273_v4 = vmin.f32 %v2089_v0, 0.0 }
  0xd4   :  { %v203_v5 = vpop.f32.mrf.mxu0  ;;  %vm305_vm2 = vcmp.gt.f32.partialorder %v2089_v0, 0.0 }
  0xd5   :  { %1734 = vpow2.f32 %v338_v2  ;;  %v2096_v6 = vadd.f32 %v203_v5, %v2074_v51  ;;  %v340_v7 = vmul.f32 1.442695, %v273_v4  ;;  %v274_v8 = vmin.f32 %v2092_v3, 0.0 }
  0xd6   :  { %1736 = vpow2.f32 %v334_v63  ;;  %v205_v9 = vpop.f32.mrf.mxu0  ;;  %vm306_vm8 = vcmp.gt.f32.partialorder %v2092_v3, 0.0 }
  0xd7   :  { %v275_v10 = vmin.f32 %v2096_v6, 0.0  ;;  %v2101_v11 = vadd.f32 %v205_v9, %v2072_v50  ;;  %1738 = vpow2.f32 %v340_v7  ;;  %v342_v15 = vmul.f32 1.442695, %v274_v8 }
  0xd8   :  { %v207_v12 = vpop.f32.mrf.mxu0  ;;  %vm307_vm7 = vcmp.gt.f32.partialorder %v2096_v6, 0.0 }
  0xd9   :  { %v344_v13 = vmul.f32 1.442695, %v275_v10  ;;  %v276_v14 = vmin.f32 %v2101_v11, 0.0  ;;  %v2105_v16 = vadd.f32 %v207_v12, %v2074_v51  ;;  %vm308_vm5 = vcmp.gt.f32.partialorder %v2101_v11, 0.0 }
  0xda   :  { %v211_v17 = vpop.f32.mrf.mxu0 }
  0xdb   :  { %v346_v18 = vmul.f32 1.442695, %v276_v14  ;;  %v2108_v19 = vadd.f32 %v211_v17, %v2072_v50  ;;  %1740 = vpow2.f32 %v344_v13  ;;  %v277_v20 = vmin.f32 %v2105_v16, 0.0 }
  0xdc   :  { %v213_v21 = vpop.f32.mrf.mxu0  ;;  %vm309_vm6 = vcmp.gt.f32.partialorder %v2105_v16, 0.0 }
  0xdd   :  { %1742 = vpow2.f32 %v346_v18  ;;  %v2112_v22 = vadd.f32 %v213_v21, %v2074_v51  ;;  %v348_v23 = vmul.f32 1.442695, %v277_v20  ;;  %v278_v24 = vmin.f32 %v2108_v19, 0.0 }
  0xde   :  { %1744 = vpow2.f32 %v342_v15  ;;  %v215_v25 = vpop.f32.mrf.mxu0  ;;  %vm310_vm12 = vcmp.gt.f32.partialorder %v2108_v19, 0.0 }
  0xdf   :  { %v279_v26 = vmin.f32 %v2112_v22, 0.0  ;;  %v2117_v27 = vadd.f32 %v215_v25, %v2072_v50  ;;  %1746 = vpow2.f32 %v348_v23  ;;  %v350_v33 = vmul.f32 1.442695, %v278_v24 }
  0xe0   :  { %v217_v28 = vpop.f32.mrf.mxu0  ;;  %v1733_v29 = vpop.eup %1732  ;;  %vm311_vm11 = vcmp.gt.f32.partialorder %v2112_v22, 0.0 }
  0xe1   :  { %v352_v30 = vmul.f32 1.442695, %v279_v26  ;;  %v280_v31 = vmin.f32 %v2117_v27, 0.0  ;;  %v2121_v34 = vadd.f32 %v217_v28, %v2074_v51  ;;  %v1409_v45 = vadd.f32 -1.0, %v1733_v29 }
  0xe2   :  { %v1735_v32 = vpop.eup %1734  ;;  %v221_v35 = vpop.f32.mrf.mxu0  ;;  %vm312_vm9 = vcmp.gt.f32.partialorder %v2117_v27, 0.0 }
  0xe3   :  { %v1737_v36 = vpop.eup %1736  ;;  %v354_v37 = vmul.f32 1.442695, %v280_v31  ;;  %v2124_v38 = vadd.f32 %v221_v35, %v2072_v50  ;;  %1748 = vpow2.f32 %v352_v30  ;;  %v281_v39 = vmin.f32 %v2121_v34, 0.0 }
  0xe4   :  { %v223_v40 = vpop.f32.mrf.mxu0  ;;  %v1410_v41 = vadd.f32 -1.0, %v1735_v32  ;;  %v1739_v42 = vpop.eup %1738  ;;  %v1408_v54 = vadd.f32 -1.0, %v1737_v36  ;;  %v431_v4 = vsel %vm303_vm3, %v2080_v55, %v1409_v45  ;;  %vm313_vm10 = vcmp.gt.f32.partialorder %v2121_v34, 0.0 }
  0xe5   :  { %1750 = vpow2.f32 %v354_v37  ;;  %v282_v43 = vmin.f32 %v2124_v38, 0.0  ;;  %v2130_v44 = vadd.f32 %v223_v40, %v2074_v51  ;;  %v356_v48 = vmul.f32 1.442695, %v281_v39 }
  0xe6   :  { %1752 = vpow2.f32 %v350_v33  ;;  %v225_v49 = vpop.f32.mrf.mxu0  ;;  %v1411_v52 = vadd.f32 -1.0, %v1739_v42  ;;  %v432_v62 = vsel %vm304_vm1, %v2085_v59, %v1410_v41  ;;  %vm314_vm0 = vcmp.gt.f32.partialorder %v2124_v38, 0.0 }
  0xe7   :  { %v358_v56 = vmul.f32 1.442695, %v282_v43  ;;  %v283_v57 = vmin.f32 %v2130_v44, 0.0  ;;  %v2134_v58 = vadd.f32 %v225_v49, %v2072_v50  ;;  %1754 = vpow2.f32 %v356_v48 }
  0xe8   :  { %v227_v60 = vpop.f32.mrf.mxu0  ;;  %v433_v61 = vsel %vm305_vm2, %v2089_v0, %v1411_v52  ;;  %v1741_v63 = vpop.eup %1740  ;;  %v430_v0 = vsel %vm302_vm4, %v2077_v53, %v1408_v54  ;;  %vm315_vm15 = vcmp.gt.f32.partialorder %v2130_v44, 0.0 }
  0xe9   :  { %v360_v1 = vmul.f32 1.442695, %v283_v57  ;;  %v284_v2 = vmin.f32 %v2134_v58, 0.0  ;;  %v2146_v7 = vadd.f32 %v227_v60, %v2074_v51  ;;  %v463_v9 = vpack.c.bf16 %v433_v61, %v431_v4 }
  0xea   :  { %v1743_v5 = vpop.eup %1742  ;;  %v231_v8 = vpop.f32.mrf.mxu0  ;;  %1756 = vpow2.f32 %v358_v56  ;;  %v462_v13 = vpack.c.bf16 %v432_v62, %v430_v0  ;;  %v1413_v20 = vadd.f32 -1.0, %v1741_v63  ;;  %vm316_vm13 = vcmp.gt.f32.partialorder %v2134_v58, 0.0 }
  0xeb   :  { %v1745_v10 = vpop.eup %1744  ;;  %v362_v12 = vmul.f32 1.442695, %v284_v2  ;;  %v2150_v59 = vadd.f32 %v231_v8, %v2072_v50  ;;  %1758 = vpow2.f32 %v360_v1  ;;  %v285_v14 = vmin.f32 %v2146_v7, 0.0  ;;  %612 = vmatprep.mubr.bf16.mxu1 %v463_v9 }
  0xec   :  { %v233_v55 = vpop.f32.mrf.mxu0  ;;  %v1414_v15 = vadd.f32 -1.0, %v1743_v5  ;;  %v1747_v17 = vpop.eup %1746  ;;  %613 = vmatmul.mubr.bf16.vlgmr.msra.gmra.mxu1 %v462_v13  ;;  %v1412_v25 = vadd.f32 -1.0, %v1745_v10  ;;  %v435_v37 = vsel %vm307_vm7, %v2096_v6, %v1413_v20  ;;  %vm317_vm14 = vcmp.gt.f32.partialorder %v2146_v7, 0.0 }
  0xed   :  { %1760 = vpow2.f32 %v362_v12  ;;  %v286_v18 = vmin.f32 %v2150_v59, 0.0  ;;  %v2155_v53 = vadd.f32 %v233_v55, %v2074_v51  ;;  %v364_v21 = vmul.f32 1.442695, %v285_v14 }
  0xee   :  { %v235_v23 = vpop.f32.mrf.mxu0  ;;  %v1415_v24 = vadd.f32 -1.0, %v1747_v17  ;;  %v436_v32 = vsel %vm308_vm5, %v2101_v11, %v1414_v15  ;;  %v434_v43 = vsel %vm306_vm8, %v2092_v3, %v1412_v25  ;;  %vm318_vm4 = vcmp.gt.f32.partialorder %v2150_v59, 0.0 }
  0xef   :  { %v366_v26 = vmul.f32 1.442695, %v286_v18  ;;  %v287_v28 = vmin.f32 %v2155_v53, 0.0  ;;  %v2161_v29 = vadd.f32 %v235_v23, %v2072_v50  ;;  %1762 = vpow2.f32 %v364_v21 }
  0xf0   :  { %v237_v30 = vpop.f32.mrf.mxu0  ;;  %v437_v31 = vsel %vm309_vm6, %v2105_v16, %v1415_v24  ;;  %v1749_v33 = vpop.eup %1748  ;;  %v464_v48 = vpack.c.bf16 %v436_v32, %v434_v43  ;;  %vm319_vm3 = vcmp.gt.f32.partialorder %v2155_v53, 0.0 }
  0xf1   :  { %v368_v35 = vmul.f32 1.442695, %v287_v28  ;;  %v288_v36 = vmin.f32 %v2161_v29, 0.0  ;;  %v2170_v40 = vadd.f32 %v237_v30, %v2074_v51  ;;  %v465_v42 = vpack.c.bf16 %v437_v31, %v435_v37 }
  0xf2   :  { %v1751_v39 = vpop.eup %1750  ;;  %v241_v41 = vpop.f32.mrf.mxu0  ;;  %1764 = vpow2.f32 %v366_v26  ;;  %v1417_v3 = vadd.f32 -1.0, %v1749_v33  ;;  %vm320_vm1 = vcmp.gt.f32.partialorder %v2161_v29, 0.0 }
  0xf3   :  { %v1753_v45 = vpop.eup %1752  ;;  %v370_v16 = vmul.f32 1.442695, %v288_v36  ;;  %v2174_v11 = vadd.f32 %v241_v41, %v2072_v50  ;;  %1766 = vpow2.f32 %v368_v35  ;;  %v289_v49 = vmin.f32 %v2170_v40, 0.0  ;;  %620 = vmatprep.mubr.bf16.mxu1 %v465_v42 }
  0xf4   :  { %v243_v6 = vpop.f32.mrf.mxu0  ;;  %v1418_v52 = vadd.f32 -1.0, %v1751_v39  ;;  %v1755_v54 = vpop.eup %1754  ;;  %621 = vmatmul.mubr.bf16.gmra.mxu1 %v464_v48  ;;  %v1416_v63 = vadd.f32 -1.0, %v1753_v45  ;;  %v439_v13 = vsel %vm311_vm11, %v2112_v22, %v1417_v3  ;;  %vm321_vm2 = vcmp.gt.f32.partialorder %v2170_v40, 0.0 }
  0xf5   :  { %1768 = vpow2.f32 %v370_v16  ;;  %v2178_v56 = vadd.f32 %v243_v6, %v2074_v51  ;;  %v372_v57 = vmul.f32 1.442695, %v289_v49  ;;  %v290_v60 = vmin.f32 %v2174_v11, 0.0 }
  0xf6   :  { %v245_v61 = vpop.f32.mrf.mxu0  ;;  %v1419_v62 = vadd.f32 -1.0, %v1755_v54  ;;  %v440_v9 = vsel %vm312_vm9, %v2117_v27, %v1418_v52  ;;  %v438_v20 = vsel %vm310_vm12, %v2108_v19, %v1416_v63  ;;  %vm322_vm8 = vcmp.gt.f32.partialorder %v2174_v11, 0.0 }
  0xf7   :  { %v291_v1 = vmin.f32 %v2178_v56, 0.0  ;;  %v2185_v2 = vadd.f32 %v245_v61, %v2072_v50  ;;  %v1757_v4 = vpop.eup %1756  ;;  %1770 = vpow2.f32 %v372_v57  ;;  %v374_v55 = vmul.f32 1.442695, %v290_v60 }
  0xf8   :  { %v247_v5 = vpop.f32.mrf.mxu0  ;;  %v441_v8 = vsel %vm313_vm10, %v2121_v34, %v1419_v62  ;;  %v1759_v0 = vpop.eup %1758  ;;  %v466_v21 = vpack.c.bf16 %v440_v9, %v438_v20  ;;  %v1420_v30 = vadd.f32 -1.0, %v1757_v4  ;;  %vm323_vm5 = vcmp.gt.f32.partialorder %v2178_v56, 0.0 }
  0xf9   :  { %v376_v10 = vmul.f32 1.442695, %v291_v1  ;;  %v292_v12 = vmin.f32 %v2185_v2, 0.0  ;;  %v2194_v15 = vadd.f32 %v247_v5, %v2074_v51  ;;  %v467_v18 = vpack.c.bf16 %v441_v8, %v439_v13 }
  0xfa   :  { %v1761_v14 = vpop.eup %1760  ;;  %v251_v17 = vpop.f32.mrf.mxu0  ;;  %v1421_v28 = vadd.f32 -1.0, %v1759_v0  ;;  %v442_v57 = vsel %vm314_vm0, %v2124_v38, %v1420_v30  ;;  %vm324_vm6 = vcmp.gt.f32.partialorder %v2185_v2, 0.0 }
  0xfb   :  { %v378_v34 = vmul.f32 1.442695, %v292_v12  ;;  %v2198_v27 = vadd.f32 %v251_v17, %v2072_v50  ;;  %1772 = vpow2.f32 %v376_v10  ;;  %v293_v23 = vmin.f32 %v2194_v15, 0.0  ;;  %628 = vmatprep.mubr.bf16.mxu1 %v467_v18 }
  0xfc   :  { %v253_v24 = vpop.f32.mrf.mxu0  ;;  %v1422_v22 = vadd.f32 -1.0, %v1761_v14  ;;  %v1763_v25 = vpop.eup %1762  ;;  %629 = vmatmul.mubr.bf16.gmra.mxu1 %v466_v21  ;;  %v443_v48 = vsel %vm315_vm15, %v2130_v44, %v1421_v28  ;;  %vm325_vm7 = vcmp.gt.f32.partialorder %v2194_v15, 0.0 }
  0xfd   :  { %1774 = vpow2.f32 %v378_v34  ;;  %v2202_v26 = vadd.f32 %v253_v24, %v2074_v51  ;;  %v380_v19 = vmul.f32 1.442695, %v293_v23  ;;  %v294_v31 = vmin.f32 %v2198_v27, 0.0 }
  0xfe   :  { %1776 = vpow2.f32 %v374_v55  ;;  %v255_v32 = vpop.f32.mrf.mxu0  ;;  %v1423_v33 = vadd.f32 -1.0, %v1763_v25  ;;  %v444_v42 = vsel %vm316_vm13, %v2134_v58, %v1422_v22  ;;  %vm326_vm12 = vcmp.gt.f32.partialorder %v2198_v27, 0.0 }
  0xff   :  { %v295_v35 = vmin.f32 %v2202_v26, 0.0  ;;  %v2209_v36 = vadd.f32 %v255_v32, %v2072_v50  ;;  %v1765_v37 = vpop.eup %1764  ;;  %1778 = vpow2.f32 %v380_v19  ;;  %v382_v6 = vmul.f32 1.442695, %v294_v31 }
 0x100   :  { %v257_v39 = vpop.f32.mrf.mxu0  ;;  %v445_v41 = vsel %vm317_vm14, %v2146_v7, %v1423_v33  ;;  %v1767_v43 = vpop.eup %1766  ;;  %v468_v60 = vpack.c.bf16 %v444_v42, %v442_v57  ;;  %v1424_v5 = vadd.f32 -1.0, %v1765_v37  ;;  %vm327_vm9 = vcmp.gt.f32.partialorder %v2202_v26, 0.0 }
 0x101   :  { %v384_v45 = vmul.f32 1.442695, %v295_v35  ;;  %v296_v16 = vmin.f32 %v2209_v36, 0.0  ;;  %v2218_v52 = vadd.f32 %v257_v39, %v2074_v51  ;;  %v469_v3 = vpack.c.bf16 %v445_v41, %v443_v48 }
 0x102   :  { %v1769_v49 = vpop.eup %1768  ;;  %v261_v54 = vpop.f32.mrf.mxu0  ;;  %v1425_v4 = vadd.f32 -1.0, %v1767_v43  ;;  %v446_v22 = vsel %vm318_vm4, %v2150_v59, %v1424_v5  ;;  %vm328_vm10 = vcmp.gt.f32.partialorder %v2209_v36, 0.0 }
 0x103   :  { %v386_v7 = vmul.f32 1.442695, %v296_v16  ;;  %v2222_v58 = vadd.f32 %v261_v54, %v2072_v50  ;;  %1780 = vpow2.f32 %v384_v45  ;;  %v297_v61 = vmin.f32 %v2218_v52, 0.0  ;;  %636 = vmatprep.mubr.bf16.mxu1 %v469_v3 }
 0x104   :  { %v263_v62 = vpop.f32.mrf.mxu0  ;;  %v1426_v44 = vadd.f32 -1.0, %v1769_v49  ;;  %v1771_v63 = vpop.eup %1770  ;;  %637 = vmatmul.mubr.bf16.gmra.mxu1 %v468_v60  ;;  %v447_v34 = vsel %vm319_vm3, %v2155_v53, %v1425_v4  ;;  %vm329_vm11 = vcmp.gt.f32.partialorder %v2218_v52, 0.0  ;;  %vm811_vm3 = vcmask 523264  }
 0x105   :  { %1782 = vpow2.f32 %v386_v7  ;;  %v2226_v1 = vadd.f32 %v263_v62, %v2074_v51  ;;  %v388_v38 = vmul.f32 1.442695, %v297_v61  ;;  %v298_v8 = vmin.f32 %v2222_v58, 0.0 }
 0x106   :  { %1784 = vpow2.f32 %v382_v6  ;;  %v265_v9 = vpop.f32.mrf.mxu0  ;;  %v1427_v0 = vadd.f32 -1.0, %v1771_v63  ;;  %v448_v55 = vsel %vm320_vm1, %v2161_v29, %v1426_v44  ;;  %vm330_vm0 = vcmp.gt.f32.partialorder %v2222_v58, 0.0 }
 0x107   :  { %v299_v10 = vmin.f32 %v2226_v1, 0.0  ;;  %v2233_v12 = vadd.f32 %v265_v9, %v2072_v50  ;;  %1786 = vpow2.f32 %v388_v38  ;;  %v390_v23 = vmul.f32 1.442695, %v298_v8  ;;  %v1724_v9 = vld [vmem:[%s2518_s2 + $0x98] sm:$0xff]  }
 0x108   :  { %v267_v13 = vpop.f32.mrf.mxu0  ;;  %v449_v14 = vsel %vm321_vm2, %v2170_v40, %v1427_v0  ;;  %v1773_v17 = vpop.eup %1772  ;;  %v470_v28 = vpack.c.bf16 %v448_v55, %v446_v22  ;;  %vm331_vm13 = vcmp.gt.f32.partialorder %v2226_v1, 0.0  ;;  %1629 = vmatprep.subr.bf16.mxu0 %v1724_v9  ;;  %v1726_v0 = vld [vmem:[%s2518_s2 + $0x88] sm:$0xff]  }
 0x109   :  { %v392_v18 = vmul.f32 1.442695, %v299_v10  ;;  %v300_v20 = vmin.f32 %v2233_v12, 0.0  ;;  %v2242_v50 = vadd.f32 %v267_v13, %v2074_v51  ;;  %v471_v24 = vpack.c.bf16 %v449_v14, %v447_v34  ;;  %1630 = vmatpush3.bf16.msra.mxu0 %v1724_v9  ;;  %v1728_v10 = vld [vmem:[%s2518_s2 + $0xb8] sm:$0xff]   ;;  %v2288_v13 = vld [vmem:[%s2519_s3 + $0x2] ss:$0 sm:$0xff] }
 0x10a   :  { %v1775_v21 = vpop.eup %1774  ;;  %v1429_v30 = vadd.f32 -1.0, %v1773_v17  ;;  %vm332_vm14 = vcmp.gt.f32.partialorder %v2233_v12, 0.0  ;;  %1653 = vmatprep.subr.bf16.mxu1 %v1728_v10 }
 0x10b   :  { %v1777_v25 = vpop.eup %1776  ;;  %v394_v40 = vmul.f32 1.442695, %v300_v20  ;;  %1788 = vpow2.f32 %v392_v18  ;;  %v301_v29 = vmin.f32 %v2242_v50, 0.0  ;;  %644 = vmatprep.mubr.bf16.mxu1 %v471_v24  ;;  %v1430_v19 = vadd.f32 -1.0, %v1775_v21  ;;  %1654 = vmatpush3.bf16.msra.mxu1 %v1728_v10 }
 0x10c   :  { %v1779_v31 = vpop.eup %1778  ;;  %645 = vmatmul.mubr.bf16.gmra.mxu1 %v470_v28  ;;  %v1428_v51 = vadd.f32 -1.0, %v1777_v25  ;;  %v451_v59 = vsel %vm323_vm5, %v2178_v56, %v1429_v30  ;;  %vm333_vm15 = vcmp.gt.f32.partialorder %v2242_v50, 0.0 }
 0x10d   :  { %1790 = vpow2.f32 %v394_v40  ;;  %v396_v53 = vmul.f32 1.442695, %v301_v29  ;;  %v1431_v32 = vadd.f32 -1.0, %v1779_v31  ;;  %v452_v35 = vsel %vm324_vm6, %v2185_v2, %v1430_v19 }
 0x10e   :  { %1792 = vpow2.f32 %v390_v23  ;;  %v450_v42 = vsel %vm322_vm8, %v2174_v11, %v1428_v51 }
 0x10f   :  { %1794 = vpow2.f32 %v396_v53  ;;  %v453_v33 = vsel %vm325_vm7, %v2194_v15, %v1431_v32  ;;  %v472_v45 = vpack.c.bf16 %v452_v35, %v450_v42 }
 0x110   :  { %v1781_v37 = vpop.eup %1780  ;;  %v473_v39 = vpack.c.bf16 %v453_v33, %v451_v59 }
 0x111   :  { %v1433_v16 = vadd.f32 -1.0, %v1781_v37 }
 0x112   :  { %v1783_v41 = vpop.eup %1782  ;;  %652 = vmatprep.mubr.bf16.mxu1 %v473_v39 }
 0x113   :  { %v1785_v43 = vpop.eup %1784  ;;  %v1434_v48 = vadd.f32 -1.0, %v1783_v41  ;;  %v455_v2 = vsel %vm327_vm9, %v2202_v26, %v1433_v16 }
 0x114   :  { %v1787_v49 = vpop.eup %1786  ;;  %653 = vmatmul.mubr.bf16.gmra.mxu1 %v472_v45  ;;  %v1432_v56 = vadd.f32 -1.0, %v1785_v43 }
 0x115   :  { %v1435_v6 = vadd.f32 -1.0, %v1787_v49  ;;  %v456_v11 = vsel %vm328_vm10, %v2209_v36, %v1434_v48 }
 0x116   :  { %v454_v7 = vsel %vm326_vm12, %v2198_v27, %v1432_v56 }
 0x117   :  { %v457_v15 = vsel %vm329_vm11, %v2218_v52, %v1435_v6  ;;  %v474_v61 = vpack.c.bf16 %v456_v11, %v454_v7 }
 0x118   :  { %v1789_v54 = vpop.eup %1788  ;;  %v475_v3 = vpack.c.bf16 %v457_v15, %v455_v2 }
 0x119   :  { %v1437_v62 = vadd.f32 -1.0, %v1789_v54 }
 0x11a   :  { %v1791_v57 = vpop.eup %1790  ;;  %660 = vmatprep.mubr.bf16.mxu1 %v475_v3 }
 0x11b   :  { %v1793_v60 = vpop.eup %1792  ;;  %v1438_v44 = vadd.f32 -1.0, %v1791_v57  ;;  %v459_v36 = vsel %vm331_vm13, %v2226_v1, %v1437_v62  ;;  %v1725_v1 = vld [vmem:[%s2518_s2 + $0x90] sm:$0xff]  }
 0x11c   :  { %v1795_v63 = vpop.eup %1794  ;;  %661 = vmatmul.mubr.bf16.gmra.mxu1 %v474_v61  ;;  %v1436_v26 = vadd.f32 -1.0, %v1793_v60  ;;  %1631 = vmatprep.subr.bf16.mxu0 %v1725_v1 }
 0x11d   :  { %v1439_v4 = vadd.f32 -1.0, %v1795_v63  ;;  %v460_v27 = vsel %vm332_vm14, %v2233_v12, %v1438_v44  ;;  %1632 = vmatpush3.bf16.msra.mxu0 %v1725_v1 }
 0x11e   :  { %v458_v38 = vsel %vm330_vm0, %v2222_v58, %v1436_v26  ;;  %1633 = vmatprep.subr.bf16.mxu0 %v1726_v0  ;;  %v1727_v58 = vld [vmem:[%s2518_s2 + $0x80] sm:$0xff]  }
 0x11f   :  { %v461_v52 = vsel %vm333_vm15, %v2242_v50, %v1439_v4  ;;  %v476_v8 = vpack.c.bf16 %v460_v27, %v458_v38 }
 0x120   :  { %v477_v5 = vpack.c.bf16 %v461_v52, %v459_v36 }
 0x121   :  { %1634 = vmatpush3.bf16.msra.mxu0 %v1726_v0 }
 0x122   :  { %668 = vmatprep.mubr.bf16.mxu1 %v477_v5  ;;  %1635 = vmatprep.subr.bf16.mxu0 %v1727_v58 }
 0x124   :  { %669 = vmatmul.mubr.bf16.gmra.mxu1 %v476_v8 }
 0x125   :  { %1636 = vmatpush3.bf16.msra.mxu0 %v1727_v58 }
 0x1ac   :  { %v1548_v12 = vpop.f32.mrf.mxu1 }
 0x1ae   :  { %v1549_v14 = vpop.f32.mrf.mxu1 }
 0x1af   :  { %v1550_v55 = vadd.f32 %v1549_v14, %v1548_v12 }
 0x1b0   :  { %v1551_v17 = vpop.f32.mrf.mxu1 }
 0x1b1   :  { %v615_v18 = vadd.f32 %v1550_v55, %v2288_v13 }
 0x1b2   :  { %v1552_v20 = vpop.f32.mrf.mxu1 }
 0x1b3   :  { %v677_v34 = vmin.f32 %v615_v18, 0.0  ;;  %v1553_v21 = vadd.f32 %v1552_v20, %v1551_v17  ;;  %vm693_vm1 = vcmp.gt.f32.partialorder %v615_v18, 0.0 }
 0x1b4   :  { %v1554_v23 = vpop.f32.mrf.mxu1 }
 0x1b5   :  { %v709_v50 = vmul.f32 1.442695, %v677_v34  ;;  %v618_v24 = vadd.f32 %v1553_v21, %v2288_v13 }
 0x1b6   :  { %v1555_v22 = vpop.f32.mrf.mxu1 }
 0x1b7   :  { %1796 = vpow2.f32 %v709_v50  ;;  %v678_v25 = vmin.f32 %v618_v24, 0.0  ;;  %v1556_v40 = vadd.f32 %v1555_v22, %v1554_v23  ;;  %vm694_vm2 = vcmp.gt.f32.partialorder %v618_v24, 0.0 }
 0x1b8   :  { %v1557_v28 = vpop.f32.mrf.mxu1 }
 0x1b9   :  { %v711_v29 = vmul.f32 1.442695, %v678_v25  ;;  %v623_v30 = vadd.f32 %v1556_v40, %v2288_v13 }
 0x1ba   :  { %v1558_v19 = vpop.f32.mrf.mxu1 }
 0x1bb   :  { %1798 = vpow2.f32 %v711_v29  ;;  %v679_v31 = vmin.f32 %v623_v30, 0.0  ;;  %v1559_v53 = vadd.f32 %v1558_v19, %v1557_v28  ;;  %vm695_vm4 = vcmp.gt.f32.partialorder %v623_v30, 0.0 }
 0x1bc   :  { %v1560_v32 = vpop.f32.mrf.mxu1 }
 0x1bd   :  { %v713_v51 = vmul.f32 1.442695, %v679_v31  ;;  %v626_v59 = vadd.f32 %v1559_v53, %v2288_v13 }
 0x1be   :  { %v1561_v33 = vpop.f32.mrf.mxu1 }
 0x1bf   :  { %1800 = vpow2.f32 %v713_v51  ;;  %v680_v35 = vmin.f32 %v626_v59, 0.0  ;;  %v1562_v37 = vadd.f32 %v1561_v33, %v1560_v32  ;;  %vm696_vm5 = vcmp.gt.f32.partialorder %v626_v59, 0.0 }
 0x1c0   :  { %v1563_v39 = vpop.f32.mrf.mxu1 }
 0x1c1   :  { %v715_v41 = vmul.f32 1.442695, %v680_v35  ;;  %v2295_v42 = vadd.f32 %v1562_v37, %v2288_v13 }
 0x1c2   :  { %v1564_v43 = vpop.f32.mrf.mxu1 }
 0x1c3   :  { %1802 = vpow2.f32 %v715_v41  ;;  %v681_v45 = vmin.f32 %v2295_v42, 0.0  ;;  %v1565_v16 = vadd.f32 %v1564_v43, %v1563_v39  ;;  %vm697_vm6 = vcmp.gt.f32.partialorder %v2295_v42, 0.0 }
 0x1c4   :  { %v1797_v48 = vpop.eup %1796  ;;  %v1566_v49 = vpop.f32.mrf.mxu1 }
 0x1c5   :  { %v717_v6 = vmul.f32 1.442695, %v681_v45  ;;  %v2299_v56 = vadd.f32 %v1565_v16, %v2288_v13  ;;  %v1457_v15 = vadd.f32 -1.0, %v1797_v48 }
 0x1c6   :  { %v1567_v2 = vpop.f32.mrf.mxu1 }
 0x1c7   :  { %1804 = vpow2.f32 %v717_v6  ;;  %v682_v11 = vmin.f32 %v2299_v56, 0.0  ;;  %v1568_v3 = vadd.f32 %v1567_v2, %v1566_v49  ;;  %v757_v44 = vsel %vm693_vm1, %v615_v18, %v1457_v15 }
 0x1c8   :  { %v1799_v54 = vpop.eup %1798  ;;  %v1569_v57 = vpop.f32.mrf.mxu1  ;;  %vm698_vm7 = vcmp.gt.f32.partialorder %v2299_v56, 0.0 }
 0x1c9   :  { %v1458_v7 = vadd.f32 -1.0, %v1799_v54  ;;  %v719_v60 = vmul.f32 1.442695, %v682_v11  ;;  %v2303_v61 = vadd.f32 %v1568_v3, %v2288_v13 }
 0x1ca   :  { %v1570_v62 = vpop.f32.mrf.mxu1 }
 0x1cb   :  { %v758_v63 = vsel %vm694_vm2, %v618_v24, %v1458_v7  ;;  %1806 = vpow2.f32 %v719_v60  ;;  %v1571_v4 = vadd.f32 %v1570_v62, %v1569_v57  ;;  %v683_v36 = vmin.f32 %v2303_v61, 0.0 }
 0x1cc   :  { %v1801_v26 = vpop.eup %1800  ;;  %v1572_v52 = vpop.f32.mrf.mxu1  ;;  %v773_v27 = vpack.c.bf16 %v758_v63, %v757_v44  ;;  %vm699_vm8 = vcmp.gt.f32.partialorder %v2303_v61, 0.0 }
 0x1cd   :  { %v2307_v5 = vadd.f32 %v1571_v4, %v2288_v13  ;;  %v721_v38 = vmul.f32 1.442695, %v683_v36  ;;  %v1459_v9 = vadd.f32 -1.0, %v1801_v26 }
 0x1ce   :  { %v1573_v8 = vpop.f32.mrf.mxu1  ;;  %1637 = vmatprep.mubr.msk.bf16.mxu0 %vm811_vm3, %v773_v27 }
 0x1cf   :  { %v684_v1 = vmin.f32 %v2307_v5, 0.0  ;;  %v1574_v0 = vadd.f32 %v1573_v8, %v1572_v52  ;;  %1808 = vpow2.f32 %v721_v38  ;;  %v759_v18 = vsel %vm695_vm4, %v623_v30, %v1459_v9 }
 0x1d0   :  { %v1803_v58 = vpop.eup %1802  ;;  %v1575_v10 = vpop.f32.mrf.mxu1  ;;  %vm700_vm9 = vcmp.gt.f32.partialorder %v2307_v5, 0.0 }
 0x1d1   :  { %v1460_v12 = vadd.f32 -1.0, %v1803_v58  ;;  %v723_v14 = vmul.f32 1.442695, %v684_v1  ;;  %v2312_v55 = vadd.f32 %v1574_v0, %v2288_v13 }
 0x1d2   :  { %v1576_v17 = vpop.f32.mrf.mxu1 }
 0x1d3   :  { %v760_v20 = vsel %vm696_vm5, %v626_v59, %v1460_v12  ;;  %1810 = vpow2.f32 %v723_v14  ;;  %v685_v34 = vmin.f32 %v2312_v55, 0.0  ;;  %v1577_v50 = vadd.f32 %v1576_v17, %v1575_v10 }
 0x1d4   :  { %v1805_v21 = vpop.eup %1804  ;;  %v774_v23 = vpack.c.bf16 %v760_v20, %v759_v18  ;;  %v1578_v24 = vpop.f32.mrf.mxu1  ;;  %vm701_vm10 = vcmp.gt.f32.partialorder %v2312_v55, 0.0 }
 0x1d5   :  { %v725_v22 = vmul.f32 1.442695, %v685_v34  ;;  %v2316_v25 = vadd.f32 %v1577_v50, %v2288_v13  ;;  %v1461_v28 = vadd.f32 -1.0, %v1805_v21 }
 0x1d6   :  { %v1579_v40 = vpop.f32.mrf.mxu1  ;;  %1638 = vmatmul.mubr.msk.bf16.vlgmr.msra.gmra.mxu0 %vm811_vm3, %v774_v23 }
 0x1d7   :  { %v1580_v29 = vadd.f32 %v1579_v40, %v1578_v24  ;;  %1812 = vpow2.f32 %v725_v22  ;;  %v686_v30 = vmin.f32 %v2316_v25, 0.0  ;;  %v761_v33 = vsel %vm697_vm6, %v2295_v42, %v1461_v28 }
 0x1d8   :  { %v1807_v19 = vpop.eup %1806  ;;  %v1581_v31 = vpop.f32.mrf.mxu1  ;;  %vm702_vm11 = vcmp.gt.f32.partialorder %v2316_v25, 0.0 }
 0x1d9   :  { %v1462_v53 = vadd.f32 -1.0, %v1807_v19  ;;  %v2321_v32 = vadd.f32 %v1580_v29, %v2288_v13  ;;  %v727_v51 = vmul.f32 1.442695, %v686_v30 }
 0x1da   :  { %v1582_v59 = vpop.f32.mrf.mxu1 }
 0x1db   :  { %v762_v35 = vsel %vm698_vm7, %v2299_v56, %v1462_v53  ;;  %v687_v37 = vmin.f32 %v2321_v32, 0.0  ;;  %v1583_v39 = vadd.f32 %v1582_v59, %v1581_v31  ;;  %1814 = vpow2.f32 %v727_v51 }
 0x1dc   :  { %v1584_v41 = vpop.f32.mrf.mxu1  ;;  %v775_v43 = vpack.c.bf16 %v762_v35, %v761_v33  ;;  %v1809_v45 = vpop.eup %1808  ;;  %vm703_vm12 = vcmp.gt.f32.partialorder %v2321_v32, 0.0 }
 0x1dd   :  { %v729_v16 = vmul.f32 1.442695, %v687_v37  ;;  %v658_v48 = vadd.f32 %v1583_v39, %v2288_v13  ;;  %v1463_v6 = vadd.f32 -1.0, %v1809_v45  ;;  %v1729_v45 = vld [vmem:[%s2518_s2 + $0xb0] sm:$0xff]  }
 0x1de   :  { %v1585_v49 = vpop.f32.mrf.mxu1  ;;  %1641 = vmatprep.mubr.msk.bf16.mxu0 %vm811_vm3, %v775_v43  ;;  %1655 = vmatprep.subr.bf16.mxu1 %v1729_v45 }
 0x1df   :  { %1816 = vpow2.f32 %v729_v16  ;;  %v688_v2 = vmin.f32 %v658_v48, 0.0  ;;  %v1586_v15 = vadd.f32 %v1585_v49, %v1584_v41  ;;  %v763_v7 = vsel %vm699_vm8, %v2303_v61, %v1463_v6  ;;  %1656 = vmatpush3.bf16.msra.mxu1 %v1729_v45  ;;  %v1730_v16 = vld [vmem:[%s2518_s2 + $0xa8] sm:$0xff]   ;;  %v2361_v49 = vld [vmem:[%s2519_s3 + $0x3] ss:$0 sm:$0xff] }
 0x1e0   :  { %v1811_v42 = vpop.eup %1810  ;;  %v1587_v11 = vpop.f32.mrf.mxu1  ;;  %vm704_vm13 = vcmp.gt.f32.partialorder %v658_v48, 0.0  ;;  %1657 = vmatprep.subr.bf16.mxu1 %v1730_v16 }
 0x1e1   :  { %v1464_v56 = vadd.f32 -1.0, %v1811_v42  ;;  %v731_v54 = vmul.f32 1.442695, %v688_v2  ;;  %v663_v3 = vadd.f32 %v1586_v15, %v2288_v13 }
 0x1e2   :  { %v1588_v57 = vpop.f32.mrf.mxu1 }
 0x1e3   :  { %v764_v60 = vsel %vm700_vm9, %v2307_v5, %v1464_v56  ;;  %1818 = vpow2.f32 %v731_v54  ;;  %v689_v62 = vmin.f32 %v663_v3, 0.0  ;;  %v1589_v44 = vadd.f32 %v1588_v57, %v1587_v11  ;;  %1658 = vmatpush3.bf16.msra.mxu1 %v1730_v16 }
 0x1e4   :  { %v1590_v63 = vpop.f32.mrf.mxu1  ;;  %v776_v4 = vpack.c.bf16 %v764_v60, %v763_v7  ;;  %v1813_v26 = vpop.eup %1812  ;;  %vm705_vm14 = vcmp.gt.f32.partialorder %v663_v3, 0.0 }
 0x1e5   :  { %v733_v36 = vmul.f32 1.442695, %v689_v62  ;;  %v666_v52 = vadd.f32 %v1589_v44, %v2288_v13  ;;  %v1465_v8 = vadd.f32 -1.0, %v1813_v26 }
 0x1e6   :  { %v1591_v27 = vpop.f32.mrf.mxu1  ;;  %1642 = vmatmul.mubr.msk.bf16.gmra.mxu0 %vm811_vm3, %v776_v4 }
 0x1e7   :  { %v1592_v38 = vadd.f32 %v1591_v27, %v1590_v63  ;;  %1820 = vpow2.f32 %v733_v36  ;;  %v690_v9 = vmin.f32 %v666_v52, 0.0  ;;  %v765_v18 = vsel %vm701_vm10, %v2312_v55, %v1465_v8 }
 0x1e8   :  { %v1593_v1 = vpop.f32.mrf.mxu1  ;;  %v1815_v61 = vpop.eup %1814  ;;  %vm706_vm15 = vcmp.gt.f32.partialorder %v666_v52, 0.0 }
 0x1e9   :  { %v671_v5 = vadd.f32 %v1592_v38, %v2288_v13  ;;  %v1466_v0 = vadd.f32 -1.0, %v1815_v61  ;;  %v735_v58 = vmul.f32 1.442695, %v690_v9 }
 0x1ea   :  { %v1594_v10 = vpop.f32.mrf.mxu1 }
 0x1eb   :  { %v691_v12 = vmin.f32 %v671_v5, 0.0  ;;  %v1595_v14 = vadd.f32 %v1594_v10, %v1593_v1  ;;  %v766_v20 = vsel %vm702_vm11, %v2316_v25, %v1466_v0  ;;  %1822 = vpow2.f32 %v735_v58 }
 0x1ec   :  { %v1817_v17 = vpop.eup %1816  ;;  %v777_v23 = vpack.c.bf16 %v766_v20, %v765_v18  ;;  %vm707_vm0 = vcmp.gt.f32.partialorder %v671_v5, 0.0 }
 0x1ed   :  { %v737_v34 = vmul.f32 1.442695, %v691_v12  ;;  %v674_v21 = vadd.f32 %v1595_v14, %v2288_v13  ;;  %v1467_v50 = vadd.f32 -1.0, %v1817_v17 }
 0x1ee   :  { %1645 = vmatprep.mubr.msk.bf16.mxu0 %vm811_vm3, %v777_v23 }
 0x1ef   :  { %1824 = vpow2.f32 %v737_v34  ;;  %v692_v24 = vmin.f32 %v674_v21, 0.0  ;;  %v767_v55 = vsel %vm703_vm12, %v2321_v32, %v1467_v50  ;;  %vm708_vm1 = vcmp.gt.f32.partialorder %v674_v21, 0.0 }
 0x1f0   :  { %v1819_v22 = vpop.eup %1818 }
 0x1f1   :  { %v1468_v40 = vadd.f32 -1.0, %v1819_v22  ;;  %v739_v28 = vmul.f32 1.442695, %v692_v24 }
 0x1f3   :  { %v768_v29 = vsel %vm704_vm13, %v658_v48, %v1468_v40  ;;  %1826 = vpow2.f32 %v739_v28  ;;  %v1731_v48 = vld [vmem:[%s2518_s2 + $0xa0] sm:$0xff]  }
 0x1f4   :  { %v778_v25 = vpack.c.bf16 %v768_v29, %v767_v55  ;;  %v1821_v19 = vpop.eup %1820  ;;  %1659 = vmatprep.subr.bf16.mxu1 %v1731_v48 }
 0x1f5   :  { %v1469_v13 = vadd.f32 -1.0, %v1821_v19  ;;  %1660 = vmatpush3.bf16.msra.mxu1 %v1731_v48 }
 0x1f6   :  { %1646 = vmatmul.mubr.msk.bf16.gmra.mxu0 %vm811_vm3, %v778_v25 }
 0x1f7   :  { %v769_v51 = vsel %vm705_vm14, %v663_v3, %v1469_v13 }
 0x1f8   :  { %v1823_v30 = vpop.eup %1822 }
 0x1f9   :  { %v1470_v31 = vadd.f32 -1.0, %v1823_v30 }
 0x1fb   :  { %v770_v59 = vsel %vm706_vm15, %v666_v52, %v1470_v31 }
 0x1fc   :  { %v1825_v53 = vpop.eup %1824  ;;  %v779_v33 = vpack.c.bf16 %v770_v59, %v769_v51 }
 0x1fd   :  { %v1471_v35 = vadd.f32 -1.0, %v1825_v53 }
 0x1fe   :  { %1649 = vmatprep.mubr.msk.bf16.mxu0 %vm811_vm3, %v779_v33 }
 0x1ff   :  { %v771_v39 = vsel %vm707_vm0, %v671_v5, %v1471_v35 }
 0x200   :  { %v1827_v37 = vpop.eup %1826 }
 0x201   :  { %v1472_v32 = vadd.f32 -1.0, %v1827_v37 }
 0x203   :  { %v772_v41 = vsel %vm708_vm1, %v674_v21, %v1472_v32 }
 0x204   :  { %v780_v43 = vpack.c.bf16 %v772_v41, %v771_v39 }
 0x206   :  { %1650 = vmatmul.mubr.msk.bf16.gmra.mxu0 %vm811_vm3, %v780_v43 }
 0x296   :  { %v1639_v6 = vpop.f32.mrf.mxu0 }
 0x297   :  { %v879_v2 = vadd.f32 %v1639_v6, %v2361_v49 }
 0x298   :  { %v870_v15 = vpop.f32.mrf.mxu0 }
 0x299   :  { %v935_v42 = vmin.f32 %v879_v2, 0.0  ;;  %v871_v11 = vadd.f32 %v2361_v49, %v870_v15  ;;  %vm951_vm6 = vcmp.gt.f32.partialorder %v879_v2, 0.0 }
 0x29a   :  { %v1640_v56 = vpop.f32.mrf.mxu0 }
 0x29b   :  { %v969_v54 = vmul.f32 1.442695, %v935_v42  ;;  %v933_v3 = vmin.f32 %v871_v11, 0.0  ;;  %v882_v57 = vadd.f32 %v1640_v56, %v2361_v49  ;;  %vm949_vm4 = vcmp.gt.f32.partialorder %v871_v11, 0.0 }
 0x29c   :  { %v873_v7 = vpop.f32.mrf.mxu0 }
 0x29d   :  { %v965_v60 = vmul.f32 1.442695, %v933_v3  ;;  %v936_v62 = vmin.f32 %v882_v57, 0.0  ;;  %v874_v44 = vadd.f32 %v2361_v49, %v873_v7  ;;  %1828 = vpow2.f32 %v969_v54 }
 0x29e   :  { %vm952_vm2 = vcmp.gt.f32.partialorder %v882_v57, 0.0 }
 0x29f   :  { %v971_v63 = vmul.f32 1.442695, %v936_v62  ;;  %1830 = vpow2.f32 %v965_v60  ;;  %v934_v4 = vmin.f32 %v874_v44, 0.0  ;;  %vm950_vm5 = vcmp.gt.f32.partialorder %v874_v44, 0.0 }
 0x2a1   :  { %1832 = vpow2.f32 %v971_v63  ;;  %v967_v26 = vmul.f32 1.442695, %v934_v4 }
 0x2a3   :  { %1834 = vpow2.f32 %v967_v26 }
 0x2a6   :  { %v1643_v36 = vpop.f32.mrf.mxu0 }
 0x2a7   :  { %v2368_v52 = vadd.f32 %v1643_v36, %v2361_v49 }
 0x2a8   :  { %v886_v27 = vpop.f32.mrf.mxu0 }
 0x2a9   :  { %v939_v38 = vmin.f32 %v2368_v52, 0.0  ;;  %v2372_v8 = vadd.f32 %v2361_v49, %v886_v27  ;;  %vm955_vm10 = vcmp.gt.f32.partialorder %v2368_v52, 0.0 }
 0x2aa   :  { %v1644_v9 = vpop.f32.mrf.mxu0  ;;  %v1829_v61 = vpop.eup %1828 }
 0x2ab   :  { %v937_v1 = vmin.f32 %v2372_v8, 0.0  ;;  %v898_v5 = vadd.f32 %v1644_v9, %v2361_v49  ;;  %v977_v10 = vmul.f32 1.442695, %v939_v38  ;;  %v1488_v24 = vadd.f32 -1.0, %v1829_v61 }
 0x2ac   :  { %v889_v0 = vpop.f32.mrf.mxu0  ;;  %v1831_v58 = vpop.eup %1830  ;;  %vm953_vm8 = vcmp.gt.f32.partialorder %v2372_v8, 0.0 }
 0x2ad   :  { %v973_v12 = vmul.f32 1.442695, %v937_v1  ;;  %v940_v17 = vmin.f32 %v898_v5, 0.0  ;;  %v890_v18 = vadd.f32 %v2361_v49, %v889_v0  ;;  %v1486_v34 = vadd.f32 -1.0, %v1831_v58 }
 0x2ae   :  { %v1833_v14 = vpop.eup %1832  ;;  %v1015_v25 = vsel %vm951_vm6, %v879_v2, %v1488_v24  ;;  %vm956_vm7 = vcmp.gt.f32.partialorder %v898_v5, 0.0 }
 0x2af   :  { %v1489_v20 = vadd.f32 -1.0, %v1833_v14  ;;  %1836 = vpow2.f32 %v973_v12  ;;  %v979_v21 = vmul.f32 1.442695, %v940_v17  ;;  %v938_v23 = vmin.f32 %v890_v18, 0.0 }
 0x2b0   :  { %v1835_v50 = vpop.eup %1834  ;;  %1838 = vpow2.f32 %v977_v10  ;;  %v1013_v55 = vsel %vm949_vm4, %v871_v11, %v1486_v34  ;;  %vm954_vm9 = vcmp.gt.f32.partialorder %v890_v18, 0.0  ;;  %vm1920_vm4 = vmmov 0  }
 0x2b1   :  { %v1487_v22 = vadd.f32 -1.0, %v1835_v50  ;;  %1840 = vpow2.f32 %v979_v21  ;;  %v975_v40 = vmul.f32 1.442695, %v938_v23  ;;  %v1016_v28 = vsel %vm952_vm2, %v882_v57, %v1489_v20 }
 0x2b2   :  { %v1030_v13 = vpack.c.bf16 %v1016_v28, %v1015_v25 }
 0x2b3   :  { %v1014_v29 = vsel %vm950_vm5, %v874_v44, %v1487_v22  ;;  %1842 = vpow2.f32 %v975_v40 }
 0x2b4   :  { %v1029_v19 = vpack.c.bf16 %v1014_v29, %v1013_v55 }
 0x2b6   :  { %v1647_v30 = vpop.f32.mrf.mxu0  ;;  %1661 = vmatprep.mubr.msk.bf16.mxu1 %vm811_vm3, %v1029_v19 }
 0x2b7   :  { %v2378_v31 = vadd.f32 %v1647_v30, %v2361_v49  ;;  %1662 = vmatmul.mubr.msk.bf16.vlgmr.msra.gmra.mxu1 %vm811_vm3, %v1030_v13 }
 0x2b8   :  { %v902_v53 = vpop.f32.mrf.mxu0 }
 0x2b9   :  { %v943_v51 = vmin.f32 %v2378_v31, 0.0  ;;  %v2384_v59 = vadd.f32 %v2361_v49, %v902_v53  ;;  %vm959_vm14 = vcmp.gt.f32.partialorder %v2378_v31, 0.0 }
 0x2ba   :  { %v1648_v33 = vpop.f32.mrf.mxu0 }
 0x2bb   :  { %v941_v35 = vmin.f32 %v2384_v59, 0.0  ;;  %v2388_v37 = vadd.f32 %v1648_v33, %v2361_v49  ;;  %v985_v41 = vmul.f32 1.442695, %v943_v51  ;;  %vm957_vm12 = vcmp.gt.f32.partialorder %v2384_v59, 0.0 }
 0x2bc   :  { %v905_v32 = vpop.f32.mrf.mxu0  ;;  %v1837_v39 = vpop.eup %1836 }
 0x2bd   :  { %v981_v43 = vmul.f32 1.442695, %v941_v35  ;;  %v1839_v45 = vpop.eup %1838  ;;  %v944_v16 = vmin.f32 %v2388_v37, 0.0  ;;  %v906_v48 = vadd.f32 %v2361_v49, %v905_v32  ;;  %v1490_v2 = vadd.f32 -1.0, %v1837_v39 }
 0x2be   :  { %v1841_v6 = vpop.eup %1840  ;;  %v1492_v54 = vadd.f32 -1.0, %v1839_v45  ;;  %vm960_vm11 = vcmp.gt.f32.partialorder %v2388_v37, 0.0  ;;  %v1919_v45 = vmov 0.0  }
 0x2bf   :  { %1844 = vpow2.f32 %v981_v43  ;;  %v1493_v15 = vadd.f32 -1.0, %v1841_v6  ;;  %v987_v42 = vmul.f32 1.442695, %v944_v16  ;;  %v942_v11 = vmin.f32 %v906_v48, 0.0  ;;  %1677 = vmatprep.subr.bf16.mxu0 %v1919_v45  ;;  %v2416_v16 = vld [vmem:[%s2519_s3 + $0x4] ss:$0 sm:$0xff]  ;;  %1693 = vmatprep.mubr.msk.bf16.mxu0 %vm1920_vm4, %v1919_v45 }
 0x2c0   :  { %v1843_v56 = vpop.eup %1842  ;;  %1846 = vpow2.f32 %v985_v41  ;;  %v1017_v60 = vsel %vm953_vm8, %v2372_v8, %v1490_v2  ;;  %v1019_v44 = vsel %vm955_vm10, %v2368_v52, %v1492_v54  ;;  %vm958_vm13 = vcmp.gt.f32.partialorder %v906_v48, 0.0 }
 0x2c1   :  { %v1491_v3 = vadd.f32 -1.0, %v1843_v56  ;;  %1848 = vpow2.f32 %v987_v42  ;;  %v983_v57 = vmul.f32 1.442695, %v942_v11  ;;  %v1020_v7 = vsel %vm956_vm7, %v898_v5, %v1493_v15 }
 0x2c2   :  { %v1032_v4 = vpack.c.bf16 %v1020_v7, %v1019_v44 }
 0x2c3   :  { %v1018_v62 = vsel %vm954_vm9, %v890_v18, %v1491_v3  ;;  %1850 = vpow2.f32 %v983_v57 }
 0x2c4   :  { %v1031_v63 = vpack.c.bf16 %v1018_v62, %v1017_v60 }
 0x2c6   :  { %v1651_v26 = vpop.f32.mrf.mxu0  ;;  %1665 = vmatprep.mubr.msk.bf16.mxu1 %vm811_vm3, %v1031_v63 }
 0x2c7   :  { %v927_v36 = vadd.f32 %v1651_v26, %v2361_v49  ;;  %1666 = vmatmul.mubr.msk.bf16.gmra.mxu1 %vm811_vm3, %v1032_v4  ;;  %v24_v26 = vld [vmem:[%s2519_s3 + $0x6] sm:$0x1] }
 0x2c8   :  { %v918_v27 = vpop.f32.mrf.mxu0  ;;  %1295 = vperm.xlu0 %1701, %v24_v26  }
 0x2c9   :  { %v947_v38 = vmin.f32 %v927_v36, 0.0  ;;  %v919_v9 = vadd.f32 %v2361_v49, %v918_v27  ;;  %vm963_vm2 = vcmp.gt.f32.partialorder %v927_v36, 0.0 }
 0x2ca   :  { %v1652_v1 = vpop.f32.mrf.mxu0 }
 0x2cb   :  { %v945_v61 = vmin.f32 %v919_v9, 0.0  ;;  %v930_v5 = vadd.f32 %v1652_v1, %v2361_v49  ;;  %v993_v52 = vmul.f32 1.442695, %v947_v38  ;;  %vm961_vm0 = vcmp.gt.f32.partialorder %v919_v9, 0.0 }
 0x2cc   :  { %v1845_v8 = vpop.eup %1844  ;;  %v921_v0 = vpop.f32.mrf.mxu0 }
 0x2cd   :  { %v989_v58 = vmul.f32 1.442695, %v945_v61  ;;  %v1847_v10 = vpop.eup %1846  ;;  %v948_v12 = vmin.f32 %v930_v5, 0.0  ;;  %v922_v14 = vadd.f32 %v2361_v49, %v921_v0  ;;  %v1494_v18 = vadd.f32 -1.0, %v1845_v8 }
 0x2ce   :  { %v1849_v17 = vpop.eup %1848  ;;  %v1496_v50 = vadd.f32 -1.0, %v1847_v10  ;;  %vm964_vm15 = vcmp.gt.f32.partialorder %v930_v5, 0.0 }
 0x2cf   :  { %v1497_v20 = vadd.f32 -1.0, %v1849_v17  ;;  %1852 = vpow2.f32 %v989_v58  ;;  %v995_v34 = vmul.f32 1.442695, %v948_v12  ;;  %v946_v21 = vmin.f32 %v922_v14, 0.0 }
 0x2d0   :  { %v1851_v23 = vpop.eup %1850  ;;  %1854 = vpow2.f32 %v993_v52  ;;  %v1021_v49 = vsel %vm957_vm12, %v2384_v59, %v1494_v18  ;;  %v1023_v55 = vsel %vm959_vm14, %v2378_v31, %v1496_v50  ;;  %vm962_vm1 = vcmp.gt.f32.partialorder %v922_v14, 0.0 }
 0x2d1   :  { %v1495_v24 = vadd.f32 -1.0, %v1851_v23  ;;  %1856 = vpow2.f32 %v995_v34  ;;  %v991_v22 = vmul.f32 1.442695, %v946_v21  ;;  %v1024_v40 = vsel %vm960_vm11, %v2388_v37, %v1497_v20 }
 0x2d2   :  { %v1034_v25 = vpack.c.bf16 %v1024_v40, %v1023_v55 }
 0x2d3   :  { %v1022_v28 = vsel %vm958_vm13, %v906_v48, %v1495_v24  ;;  %1858 = vpow2.f32 %v991_v22 }
 0x2d4   :  { %v1033_v29 = vpack.c.bf16 %v1022_v28, %v1021_v49 }
 0x2d6   :  { %1669 = vmatprep.mubr.msk.bf16.mxu1 %vm811_vm3, %v1033_v29 }
 0x2d7   :  { %1670 = vmatmul.mubr.msk.bf16.gmra.mxu1 %vm811_vm3, %v1034_v25 }
 0x2dc   :  { %v1853_v19 = vpop.eup %1852 }
 0x2dd   :  { %v1855_v13 = vpop.eup %1854  ;;  %v1498_v53 = vadd.f32 -1.0, %v1853_v19 }
 0x2de   :  { %v1857_v30 = vpop.eup %1856  ;;  %v1500_v35 = vadd.f32 -1.0, %v1855_v13 }
 0x2df   :  { %v1501_v51 = vadd.f32 -1.0, %v1857_v30  ;;  %v1025_v31 = vsel %vm961_vm0, %v919_v9, %v1498_v53 }
 0x2e0   :  { %v1859_v33 = vpop.eup %1858  ;;  %v1027_v39 = vsel %vm963_vm2, %v927_v36, %v1500_v35 }
 0x2e1   :  { %v1499_v37 = vadd.f32 -1.0, %v1859_v33  ;;  %v1028_v59 = vsel %vm964_vm15, %v930_v5, %v1501_v51 }
 0x2e2   :  { %v1036_v43 = vpack.c.bf16 %v1028_v59, %v1027_v39 }
 0x2e3   :  { %v1026_v32 = vsel %vm962_vm1, %v922_v14, %v1499_v37 }
 0x2e4   :  { %v1035_v41 = vpack.c.bf16 %v1026_v32, %v1025_v31 }
 0x2e6   :  { %1673 = vmatprep.mubr.msk.bf16.mxu1 %vm811_vm3, %v1035_v41 }
 0x2e7   :  { %1674 = vmatmul.mubr.msk.bf16.gmra.mxu1 %vm811_vm3, %v1036_v43 }
 0x377   :  { %v1663_v48 = vpop.f32.mrf.mxu1 }
 0x378   :  { %v1134_v6 = vadd.f32 %v1663_v48, %v2416_v16 }
 0x379   :  { %v1125_v2 = vpop.f32.mrf.mxu1 }
 0x37a   :  { %v1190_v15 = vmin.f32 %v1134_v6, 0.0  ;;  %v1126_v42 = vadd.f32 %v2416_v16, %v1125_v2  ;;  %vm1206_vm5 = vcmp.gt.f32.partialorder %v1134_v6, 0.0 }
 0x37b   :  { %v1664_v11 = vpop.f32.mrf.mxu1 }
 0x37c   :  { %v1224_v56 = vmul.f32 1.442695, %v1190_v15  ;;  %v1188_v54 = vmin.f32 %v1126_v42, 0.0  ;;  %v1137_v3 = vadd.f32 %v1664_v11, %v2416_v16  ;;  %vm1204_vm7 = vcmp.gt.f32.partialorder %v1126_v42, 0.0 }
 0x37d   :  { %v1128_v57 = vpop.f32.mrf.mxu1 }
 0x37e   :  { %1860 = vpow2.f32 %v1224_v56  ;;  %v1220_v7 = vmul.f32 1.442695, %v1188_v54  ;;  %v1191_v60 = vmin.f32 %v1137_v3, 0.0  ;;  %v1129_v62 = vadd.f32 %v2416_v16, %v1128_v57 }
 0x37f   :  { %vm1207_vm6 = vcmp.gt.f32.partialorder %v1137_v3, 0.0 }
 0x380   :  { %v1226_v44 = vmul.f32 1.442695, %v1191_v60  ;;  %1862 = vpow2.f32 %v1220_v7  ;;  %v1189_v63 = vmin.f32 %v1129_v62, 0.0  ;;  %vm1205_vm8 = vcmp.gt.f32.partialorder %v1129_v62, 0.0 }
 0x382   :  { %1864 = vpow2.f32 %v1226_v44  ;;  %v1222_v4 = vmul.f32 1.442695, %v1189_v63 }
 0x384   :  { %1866 = vpow2.f32 %v1222_v4 }
 0x387   :  { %v2426_v27 = vpop.f32.mrf.mxu1 }
 0x388   :  { %v2467_v60 = vadd.f32 %v2426_v27, %v2416_v16 }
 0x389   :  { %v2428_v61 = vpop.f32.mrf.mxu1 }
 0x38a   :  { %vm1210_vm2 = vcmp.gt.f32.partialorder %v2467_v60, 0.0 }
 0x38b   :  { %v1861_v36 = vpop.eup %1860  ;;  %v1668_v12 = vpop.f32.mrf.mxu1 }
 0x38c   :  { %v1517_v9 = vadd.f32 -1.0, %v1861_v36  ;;  %v2463_v56 = vadd.f32 %v1668_v12, %v2416_v16 }
 0x38d   :  { %v1863_v38 = vpop.eup %1862  ;;  %v1144_v34 = vpop.f32.mrf.mxu1 }
 0x38e   :  { %v1515_v5 = vadd.f32 -1.0, %v1863_v38  ;;  %v2430_v52 = vsel %vm1206_vm5, %v1134_v6, %v1517_v9  ;;  %v1195_v4 = vmin.f32 %v2463_v56, 0.0  ;;  %vm1211_vm1 = vcmp.gt.f32.partialorder %v2463_v56, 0.0 }
 0x38f   :  { %v1865_v1 = vpop.eup %1864 }
 0x390   :  { %v1518_v8 = vadd.f32 -1.0, %v1865_v1  ;;  %v2436_v17 = vsel %vm1204_vm7, %v1126_v42, %v1515_v5  ;;  %v1194_v1 = vmin.f32 %v2467_v60, 0.0  ;;  %v1234_v5 = vmul.f32 1.442695, %v1195_v4 }
 0x391   :  { %v1867_v0 = vpop.eup %1866 }
 0x392   :  { %v2432_v58 = vsel %vm1207_vm6, %v1137_v3, %v1518_v8  ;;  %v1516_v10 = vadd.f32 -1.0, %v1867_v0  ;;  %v1145_v0 = vadd.f32 %v2416_v16, %v1144_v34 }
 0x393   :  { %v1286_v14 = vpack.c.bf16 %v2432_v58, %v2430_v52 }
 0x394   :  { %v2438_v18 = vsel %vm1205_vm8, %v1129_v62, %v1516_v10  ;;  %vm1209_vm4 = vcmp.gt.f32.partialorder %v1145_v0, 0.0 }
 0x395   :  { %v1285_v20 = vpack.c.bf16 %v2438_v18, %v2436_v17 }
 0x397   :  { %v1671_v21 = vpop.f32.mrf.mxu1 }
 0x398   :  { %v2450_v37 = vadd.f32 %v1671_v21, %v2416_v16  ;;  %v1232_v21 = vmul.f32 1.442695, %v1194_v1 }
 0x399   :  { %v1157_v23 = vpop.f32.mrf.mxu1 }
 0x39a   :  { %v1198_v41 = vmin.f32 %v2450_v37, 0.0  ;;  %v2458_v2 = vadd.f32 %v2416_v16, %v1157_v23  ;;  %v1142_v23 = vadd.f32 %v2416_v16, %v2428_v61  ;;  %vm1214_vm14 = vcmp.gt.f32.partialorder %v2450_v37, 0.0 }
 0x39b   :  { %v1672_v50 = vpop.f32.mrf.mxu1 }
 0x39c   :  { %v2446_v53 = vadd.f32 %v1672_v50, %v2416_v16  ;;  %v1240_v6 = vmul.f32 1.442695, %v1198_v41  ;;  %v1196_v11 = vmin.f32 %v2458_v2, 0.0  ;;  %vm1212_vm0 = vcmp.gt.f32.partialorder %v2458_v2, 0.0 }
 0x39d   :  { %v1160_v24 = vpop.f32.mrf.mxu1  ;;  %vm1208_vm5 = vcmp.gt.f32.partialorder %v1142_v23, 0.0 }
 0x39e   :  { %v1199_v32 = vmin.f32 %v2446_v53, 0.0  ;;  %v2455_v48 = vadd.f32 %v2416_v16, %v1160_v24  ;;  %v1236_v62 = vmul.f32 1.442695, %v1196_v11  ;;  %vm1215_vm13 = vcmp.gt.f32.partialorder %v2446_v53, 0.0 }
 0x3a0   :  { %v1242_v43 = vmul.f32 1.442695, %v1199_v32  ;;  %v1197_v15 = vmin.f32 %v2455_v48, 0.0  ;;  %vm1213_vm15 = vcmp.gt.f32.partialorder %v2455_v48, 0.0 }
 0x3a2   :  { %v1238_v54 = vmul.f32 1.442695, %v1197_v15 }
 0x3a7   :  { %v1675_v22 = vpop.f32.mrf.mxu1 }
 0x3a8   :  { %v1182_v40 = vadd.f32 %v1675_v22, %v2416_v16 }
 0x3a9   :  { %v1173_v49 = vpop.f32.mrf.mxu1 }
 0x3aa   :  { %v1202_v28 = vmin.f32 %v1182_v40, 0.0  ;;  %v1174_v55 = vadd.f32 %v2416_v16, %v1173_v49  ;;  %vm1218_vm9 = vcmp.gt.f32.partialorder %v1182_v40, 0.0 }
 0x3ab   :  { %v1676_v29 = vpop.f32.mrf.mxu1 }
 0x3ac   :  { %v1248_v25 = vmul.f32 1.442695, %v1202_v28  ;;  %v1200_v19 = vmin.f32 %v1174_v55, 0.0  ;;  %v1185_v13 = vadd.f32 %v1676_v29, %v2416_v16  ;;  %vm1216_vm12 = vcmp.gt.f32.partialorder %v1174_v55, 0.0 }
 0x3ad   :  { %v1176_v30 = vpop.f32.mrf.mxu1  ;;  %v1192_v28 = vmin.f32 %v1142_v23, 0.0 }
 0x3ae   :  { %1868 = vpow2.f32 %v1248_v25  ;;  %v1203_v51 = vmin.f32 %v1185_v13, 0.0  ;;  %v1177_v33 = vadd.f32 %v2416_v16, %v1176_v30  ;;  %v1244_v35 = vmul.f32 1.442695, %v1200_v19 }
 0x3af   :  { %vm1219_vm10 = vcmp.gt.f32.partialorder %v1185_v13, 0.0  ;;  %v1228_v16 = vmul.f32 1.442695, %v1192_v28 }
 0x3b0   :  { %v1250_v59 = vmul.f32 1.442695, %v1203_v51  ;;  %v1201_v31 = vmin.f32 %v1177_v33, 0.0  ;;  %vm1217_vm11 = vcmp.gt.f32.partialorder %v1177_v33, 0.0 }
 0x3b2   :  { %1870 = vpow2.f32 %v1250_v59  ;;  %v1246_v39 = vmul.f32 1.442695, %v1201_v31 }
 0x3b3   :  { %1872 = vpow2.f32 %v1244_v35 }
 0x3b4   :  { %1874 = vpow2.f32 %v1246_v39 }
 0x3b5   :  { %1876 = vpow2.f32 %v1242_v43 }
 0x3b6   :  { %1878 = vpow2.f32 %v1240_v6 }
 0x3b7   :  { %1880 = vpow2.f32 %v1238_v54 }
 0x3b8   :  { %1882 = vpow2.f32 %v1236_v62 }
 0x3b9   :  { %1884 = vpow2.f32 %v1234_v5 }
 0x3ba   :  { %1886 = vpow2.f32 %v1232_v21 }
 0x3bb   :  { %v1869_v42 = vpop.eup %1868 }
 0x3bc   :  { %v1529_v3 = vadd.f32 -1.0, %v1869_v42 }
 0x3be   :  { %v1282_v26 = vsel %vm1218_vm9, %v1182_v40, %v1529_v3  ;;  %v1193_v40 = vmin.f32 %v1145_v0, 0.0 }
 0x3bf   :  { %v1871_v57 = vpop.eup %1870 }
 0x3c0   :  { %v1873_v7 = vpop.eup %1872  ;;  %v1530_v44 = vadd.f32 -1.0, %v1871_v57  ;;  %v1230_v25 = vmul.f32 1.442695, %v1193_v40 }
 0x3c1   :  { %v1875_v63 = vpop.eup %1874  ;;  %v1527_v8 = vadd.f32 -1.0, %v1873_v7 }
 0x3c2   :  { %v1283_v36 = vsel %vm1219_vm10, %v1185_v13, %v1530_v44  ;;  %v1528_v38 = vadd.f32 -1.0, %v1875_v63  ;;  %v1877_v12 = vpop.eup %1876  ;;  %1888 = vpow2.f32 %v1230_v25  ;;  %v1306_v44 = vsel %vm811_vm3, %v1285_v20, 0  ;;  %v23_v63 = vld [vmem:[%s2519_s3 + $0x5] sm:$0x1]  ;;  %s1921_s3 = smov [#allocation2]  }
 0x3c3   :  { %v1292_v9 = vpack.c.bf16 %v1283_v36, %v1282_v26  ;;  %v1280_v50 = vsel %vm1216_vm12, %v1174_v55, %v1527_v8  ;;  %v1879_v24 = vpop.eup %1878  ;;  %v1526_v49 = vadd.f32 -1.0, %v1877_v12  ;;  %1890 = vpow2.f32 %v1228_v16  ;;  %v1296_v26 = vpop.permute.xlu0 %1295  ;;  %s1388_s1 = sshll.u32 %s1921_s3, 4  ;;  %s1389_s1 = int_to_ptr.vmem [resolvable:$true] %s1388_s1 }
 0x3c4   :  { %v1281_v10 = vsel %vm1217_vm11, %v1177_v33, %v1528_v38  ;;  %v1525_v29 = vadd.f32 -1.0, %v1879_v24  ;;  %v1881_v13 = vpop.eup %1880  ;;  %v1284_v4 = vpack.c.bf16 %v23_v63, %v23_v63  ;;  %v1301_v52 = vrot.slane %v1296_v26, %v104_v47  ;;  %s1896_s5 = scalar_lea.vmem %s1389_s1, 16  ;;  %s1900_s6 = scalar_lea.vmem %s1389_s1, 32 }
 0x3c5   :  { %v1327_v27 = vsel %vm811_vm3, %v1292_v9, 0  ;;  %v1291_v22 = vpack.c.bf16 %v1281_v10, %v1280_v50  ;;  %v1279_v19 = vsel %vm1215_vm13, %v2446_v53, %v1526_v49  ;;  %v1883_v55 = vpop.eup %1882  ;;  %v1524_v51 = vadd.f32 -1.0, %v1881_v13  ;;  %p1897_p0 = scmp.ne.s32.totalorder %s1389_s1, %s1896_s5  ;;  %p1901_p1 = scmp.lt.s32.totalorder %s1389_s1, %s1389_s1 }
 0x3c6   :  { %1678 = vmatpush3.bf16.xpose.msra.mxu0 %v1327_v27  ;;  %v1278_v61 = vsel %vm1214_vm14, %v2450_v37, %v1525_v29  ;;  %v1523_v33 = vadd.f32 -1.0, %v1883_v55  ;;  %v1885_v59 = vpop.eup %1884  ;;  %p1902_p2 = scmp.lt.s32.totalorder %s1900_s6, %s1896_s5 }
 0x3c7   :  { %1679 = vmatprep.subr.bf16.mxu0 %v1919_v45  ;;  %v1324_v34 = vsel %vm811_vm3, %v1291_v22, 0  ;;  %v1290_v30 = vpack.c.bf16 %v1279_v19, %v1278_v61  ;;  %v1277_v53 = vsel %vm1213_vm15, %v2455_v48, %v1524_v51  ;;  %v1887_v31 = vpop.eup %1886  ;;  %v1522_v39 = vadd.f32 -1.0, %v1885_v59 }
 0x3c8   :  { %v1276_v37 = vsel %vm1212_vm0, %v2458_v2, %v1523_v33  ;;  %v1521_v41 = vadd.f32 -1.0, %v1887_v31  ;;  %p1903_p3 = por %p1902_p2, %p1901_p1 }
 0x3c9   :  { %v1321_v35 = vsel %vm811_vm3, %v1290_v30, 0  ;;  %v1289_v32 = vpack.c.bf16 %v1277_v53, %v1276_v37  ;;  %v1275_v6 = vsel %vm1211_vm1, %v2463_v56, %v1522_v39 }
 0x3ca   :  { %v1274_v15 = vsel %vm1210_vm2, %v2467_v60, %v1521_v41  ;;  %v1309_v60 = vsel %vm811_vm3, %v1286_v14, 0  ;;  %p1904_p4 = pnand %p1903_p3, %p1897_p0 }
 0x3cb   :  { %v1318_v43 = vsel %vm811_vm3, %v1289_v32, 0  ;;  %v1288_v2 = vpack.c.bf16 %v1275_v6, %v1274_v15 }
 0x3cd   :  { %v1315_v3 = vsel %vm811_vm3, %v1288_v2, 0 }
 0x3ce   :  { %1680 = vmatpush3.bf16.xpose.msra.mxu0 %v1324_v34 }
 0x3cf   :  { %1681 = vmatprep.subr.bf16.mxu0 %v1919_v45  ;;  %v1889_v48 = vpop.eup %1888 }
 0x3d0   :  { %v1891_v42 = vpop.eup %1890  ;;  %v1520_v11 = vadd.f32 -1.0, %v1889_v48 }
 0x3d1   :  { %v1519_v54 = vadd.f32 -1.0, %v1891_v42 }
 0x3d2   :  { %v1273_v57 = vsel %vm1209_vm4, %v1145_v0, %v1520_v11 }
 0x3d3   :  { %v1272_v56 = vsel %vm1208_vm5, %v1142_v23, %v1519_v54 }
 0x3d4   :  { %v1287_v7 = vpack.c.bf16 %v1273_v57, %v1272_v56 }
 0x3d6   :  { %1682 = vmatpush3.bf16.xpose.msra.mxu0 %v1321_v35  ;;  %v1312_v62 = vsel %vm811_vm3, %v1287_v7, 0 }
 0x3d7   :  { %1683 = vmatprep.subr.bf16.mxu0 %v1919_v45 }
 0x3de   :  { %1684 = vmatpush3.bf16.xpose.msra.mxu0 %v1318_v43 }
 0x3df   :  { %1685 = vmatprep.subr.bf16.mxu0 %v1919_v45 }
 0x3e6   :  { %1686 = vmatpush3.bf16.xpose.msra.mxu0 %v1315_v3 }
 0x3e7   :  { %1687 = vmatprep.subr.bf16.mxu0 %v1919_v45 }
 0x3ee   :  { %1688 = vmatpush3.bf16.xpose.msra.mxu0 %v1312_v62 }
 0x3ef   :  { %1689 = vmatprep.subr.bf16.mxu0 %v1919_v45 }
 0x3f6   :  { %1690 = vmatpush3.bf16.xpose.msra.mxu0 %v1309_v60 }
 0x3f7   :  { %1691 = vmatprep.subr.bf16.mxu0 %v1919_v45 }
 0x3fe   :  { %1692 = vmatpush3.bf16.xpose.msra.mxu0 %v1306_v44 }
 0x405   :  { %1694 = vmatmul.mubr.msk.bf16.vlgmr.msra.gmra.mxu0 %vm811_vm3, %v1284_v4 }
 0x4c5   :  { %v1363_v58 = vpop.f32.mrf.mxu0 }
 0x4c6   :  { %v1364_v14 = vadd.f32 %v1363_v58, %v1301_v52 }
 0x4c7   :  { %v1695_v45 = vpop.f32.mrf.mxu0 }
 0x4c8   :  { %v1369_v36 = vand.u32 2147483647, %v1364_v14  ;;  %vm1373_vm6 = vcmp.ge.f32.partialorder %v1364_v14, 0.0 }
 0x4c9   :  { %v1366_v38 = vpop.f32.mrf.mxu0 }
 0x4ca   :  { %v1370_v17 = vsub.f32 0.0, %v1369_v36 }
 0x4cb   :  { %v1696_v18 = vpop.f32.mrf.mxu0 }
 0x4cc   :  { %v1371_v20 = vmul.f32 1.442695, %v1370_v17 }
 0x4ce   :  { %1892 = vpow2.f32 %v1371_v20 }
 0x4db   :  { %v1893_v9 = vpop.eup %1892 }
 0x4dc   :  { %v1374_v1 = vadd.f32 1.0, %v1893_v9 }
 0x4de   :  { %1894 = vrcp.f32 %v1374_v1 }
 0x4eb   :  { %v1895_v8 = vpop.eup %1894 }
 0x4ec   :  { %v1377_v27 = vmul.f32 %v1895_v8, %v1893_v9 }
 0x4ee   :  { %v1378_v5 = vsel %vm1373_vm6, %v1895_v8, %v1377_v27 }
 0x4ef   :  { %v1379_v46 = vmax.f32 %v1378_v5, 0.0 }
 0x4f1   :  { %v1380_v47 = vmin.f32 %v1379_v46, 1.0 }
 0x4f3   :  { %1381 = vst [vmem:[#allocation2] sm:$0x1] %v1380_v47 }
 0x4f4   :  { %1907 = shalt.err (!%p1904_p4)
}
 0x4f5   :  { %1391 = dma.vmem_to_hbm [thread:$0]  %s1389_s1, 16, %s2520_s4, [#allocation3]  }
 0x4f6   :  { %1916 = dma.done.wait [#allocation3], 16  }
 0x4f7   :  { %1917 = vsyncadd [#allocation3], 4294967280 }
 0x4f8   :  { %1395 = vsyncpa [#allocation3], 1 }

</bundles_post_ra>
